<compile_context>
chip_gen: v7x
topology: tpu7x:2x2x1
jax: 0.10.0
libtpu: 0.0.40
codegen_flags: <defaults>
</compile_context>

<pallas_src>
import jax
import jax.numpy as jnp
from jax import lax
from jax.experimental import pallas as pl
from jax.experimental.pallas import tpu as pltpu

NUM_CLASSES = 2
NUM_FEATURES = 309

D_IN = NUM_FEATURES + NUM_CLASSES   # 311
D_H1 = 400
D_H2 = 1000

# lane-padded hidden dims (zero padding is inert through matmul + LeakyReLU)
D_H1_P = 512
D_H2_P = 1024

MIN_TB = 16      # bf16-friendly sublane multiple
MAX_TB = 512     # per-step batch-tile cap (total VMEM stays well under 32 MiB)


def _round_up(n, m):
    return ((n + m - 1) // m) * m


def _cdiv(a, b):
    return (a + b - 1) // b


def _leaky_relu(x, slope=0.2):
    return jnp.where(x > 0, x, slope * x)


def _disc_kernel(x_ref, lab_ref, w1x_ref, b1c0_ref, b1d_ref,
                 w2_ref, b2_ref, w3t_ref, b3_ref, o_ref):
    # ---- Layer 1: Linear(311 -> 400); embedding folded into per-class bias.
    # x block is raw f32 features; bf16 cast happens here (no HBM round trip).
    x = x_ref[...].astype(jnp.bfloat16)                                  # (TB, 309)
    h1 = jnp.dot(x, w1x_ref[...], preferred_element_type=jnp.float32)    # (TB, 512)
    # label in {0,1}:  bias(c) = b1c0 + c * (b1c1 - b1c0)
    bias1 = b1c0_ref[...] + lab_ref[...] * b1d_ref[...]                  # (TB, 512)
    h1 = _leaky_relu(h1 + bias1)
    # Dropout(p=0.2) -> identity (eval mode)

    # ---- Layer 2: Linear(400 -> 1000)
    h2 = jnp.dot(h1.astype(jnp.bfloat16), w2_ref[...],
                 preferred_element_type=jnp.float32)                     # (TB, 1024)
    h2 = _leaky_relu(h2 + b2_ref[...])
    # Dropout(p=0.2) -> identity (eval mode)

    # ---- Layer 3: Linear(1000 -> 1) as (1,K) x (TB,K)^T on the MXU so the
    # logits (and hence the output store) are lane-dense.  f32 operands keep
    # the final layer at reference precision.
    z = lax.dot_general(w3t_ref[...], h2,
                        dimension_numbers=(((1,), (1,)), ((), ())),
                        preferred_element_type=jnp.float32)              # (1, TB)
    z = z + b3_ref[0, 0]

    # Numerically safe sigmoid (exp argument always <= 0).
    pos = z >= 0
    ez = jnp.exp(jnp.where(pos, -z, z))
    o_ref[...] = jnp.where(pos, 1.0, ez) * pl.reciprocal(1.0 + ez, approx=True)


def prepare_params(params):
    """One-time split / pad / bf16-cast of the parameters for the kernel."""
    w1 = params["w1"].astype(jnp.float32)          # (311, 400)
    b1 = params["b1"].astype(jnp.float32)          # (400,)
    emb = params["emb"].astype(jnp.float32)        # (2, 2)

    # Feature part of layer 1 (400 -> 512 lane pad), bf16 for the MXU.
    w1x = jnp.pad(w1[:NUM_FEATURES],
                  ((0, 0), (0, D_H1_P - D_H1))).astype(jnp.bfloat16)     # (309, 512)
    # Class part folded into per-class biases: bias(c) = b1 + emb[c] @ W1[309:311].
    w1c = w1[NUM_FEATURES:]                        # (2, 400)
    bias_c = b1[None, :] + emb @ w1c               # (2, 400)
    b1c0 = jnp.pad(bias_c[0:1], ((0, 0), (0, D_H1_P - D_H1)))            # (1, 512)
    b1d = jnp.pad(bias_c[1:2] - bias_c[0:1], ((0, 0), (0, D_H1_P - D_H1)))

    w2 = jnp.pad(params["w2"],
                 ((0, D_H1_P - D_H1), (0, D_H2_P - D_H2))).astype(jnp.bfloat16)
    b2 = jnp.pad(params["b2"].reshape(1, D_H2),
                 ((0, 0), (0, D_H2_P - D_H2))).astype(jnp.float32)
    w3t = jnp.pad(params["w3"].reshape(1, D_H2),
                  ((0, 0), (0, D_H2_P - D_H2))).astype(jnp.float32)      # (1, 1024)
    b3 = params["b3"].reshape(1, 1).astype(jnp.float32)                  # SMEM scalar
    return {"w1x": w1x, "b1c0": b1c0, "b1d": b1d,
            "w2": w2, "b2": b2, "w3t": w3t, "b3": b3}


@jax.jit
def discriminator_forward(x, labels, prepped):
    """x: [B, 309] float32, labels: [B] int. Returns sigmoid(out).squeeze()."""
    B = x.shape[0]
    x = x.reshape(B, NUM_FEATURES).astype(jnp.float32)
    lab = labels.reshape(B, 1).astype(jnp.float32)

    rows = B
    if rows < MIN_TB:                      # tiny batches: pad rows to one min tile
        x = jnp.pad(x, ((0, MIN_TB - rows), (0, 0)))
        lab = jnp.pad(lab, ((0, MIN_TB - rows), (0, 0)))
        rows = MIN_TB

    # Batch tile: multiple of 16, capped, and ~ceil(rows/2) so batches >= 32 make
    # >= 2 grid steps (the "parallel" axis then shards across both v7x TCs).
    TB = max(MIN_TB, min(MAX_TB, _round_up(_cdiv(rows, 2), MIN_TB)))
    G = _cdiv(rows, TB)   # a ragged last block reads garbage rows; those stay
                          # row-local and are trimmed after the call.

    flops = 2 * G * TB * (NUM_FEATURES * D_H1_P + D_H1_P * D_H2_P + D_H2_P)
    bytes_accessed = (
        rows * NUM_FEATURES * 4 + rows * 4                  # x + labels (read once)
        + NUM_FEATURES * D_H1_P * 2 + D_H1_P * D_H2_P * 2   # bf16 weights
        + (2 * D_H1_P + 2 * D_H2_P + 1) * 4                 # biases + w3 row
        + G * TB * 4)                                       # output

    out = pl.pallas_call(
        _disc_kernel,
        out_shape=jax.ShapeDtypeStruct((G, TB), jnp.float32),
        grid=(G,),
        in_specs=[
            pl.BlockSpec((TB, NUM_FEATURES), lambda i: (i, 0)),       # x rows
            pl.BlockSpec((TB, 1), lambda i: (i, 0)),                  # labels
            pl.BlockSpec((NUM_FEATURES, D_H1_P), lambda i: (0, 0)),   # w1x (resident)
            pl.BlockSpec((1, D_H1_P), lambda i: (0, 0)),              # b1 class-0
            pl.BlockSpec((1, D_H1_P), lambda i: (0, 0)),              # b1 class delta
            pl.BlockSpec((D_H1_P, D_H2_P), lambda i: (0, 0)),         # w2 (resident)
            pl.BlockSpec((1, D_H2_P), lambda i: (0, 0)),              # b2
            pl.BlockSpec((1, D_H2_P), lambda i: (0, 0)),              # w3 row (f32)
            pl.BlockSpec(memory_space=pltpu.MemorySpace.SMEM),        # b3 scalar
        ],
        out_specs=pl.BlockSpec((1, TB), lambda i: (i, 0)),            # lane-dense
        compiler_params=pltpu.CompilerParams(
            dimension_semantics=("parallel",),
            vmem_limit_bytes=32 << 20,
        ),
        cost_estimate=pl.CostEstimate(
            flops=flops, transcendentals=2 * G * TB, bytes_accessed=bytes_accessed),
    )(x, lab, prepped["w1x"], prepped["b1c0"], prepped["b1d"],
      prepped["w2"], prepped["b2"], prepped["w3t"], prepped["b3"])

    # Lane-dense (G, TB) -> flat, trim batch padding, squeeze like PyTorch.
    return jnp.squeeze(out.reshape(G * TB)[:B])


def init_params(key):
    """Deterministic init matching the PyTorch module's parameter shapes."""
    ks = jax.random.split(key, 7)

    def linear(kw, kb, fan_in, fan_out):
        bound = 1.0 / jnp.sqrt(fan_in)
        w = jax.random.uniform(kw, (fan_in, fan_out), jnp.float32, -bound, bound)
        b = jax.random.uniform(kb, (fan_out,), jnp.float32, -bound, bound)
        return w, b

    emb = jax.random.normal(ks[0], (NUM_CLASSES, NUM_CLASSES), jnp.float32)
    w1, b1 = linear(ks[1], ks[2], NUM_FEATURES + NUM_CLASSES, D_H1)
    w2, b2 = linear(ks[3], ks[4], D_H1, D_H2)
    w3, b3 = linear(ks[5], ks[6], D_H2, 1)
    return {"emb": emb, "w1": w1, "b1": b1, "w2": w2, "b2": b2,
            "w3": w3, "b3": b3}


def _reference_bf16(x, labels, params):
    """Pure-JAX reference with matching bf16-operand / f32-accum numerics."""
    B = x.shape[0]
    c = params["emb"][labels]
    h = jnp.concatenate([x.reshape(B, NUM_FEATURES), c], axis=1)
    h = _leaky_relu(
        jnp.dot(h.astype(jnp.bfloat16), params["w1"].astype(jnp.bfloat16),
                preferred_element_type=jnp.float32) + params["b1"])
    h = _leaky_relu(
        jnp.dot(h.astype(jnp.bfloat16), params["w2"].astype(jnp.bfloat16),
                preferred_element_type=jnp.float32) + params["b2"])
    logit = h @ params["w3"] + params["b3"]
    return jnp.squeeze(jax.nn.sigmoid(logit))


if __name__ == "__main__":
    key = jax.random.PRNGKey(0)
    k_param, k_x, k_lab = jax.random.split(key, 3)

    B = 16
    params = init_params(k_param)
    prepped = prepare_params(params)          # one-time pad + bf16 cast

    x = jax.random.normal(k_x, (B, NUM_FEATURES), jnp.float32)
    labels = jax.random.randint(k_lab, (B,), 0, NUM_CLASSES, jnp.int32)

    out = discriminator_forward(x, labels, prepped)
    out = jax.block_until_ready(out)

    ref = _reference_bf16(x, labels, params)
    assert out.shape == (B,), out.shape
    assert bool(jnp.all(jnp.isfinite(out))), out
    assert jnp.allclose(out, ref, atol=5e-3, rtol=0), (out, ref)

    print("KERNEL_OK")
</pallas_src>

<mosaic_0001>
module attributes {stable_mosaic.version = 11 : i64} {
  func.func @_disc_kernel(%arg0: i32, %arg1: memref<16x309xf32, #tpu.memory_space<vmem>>, %arg2: memref<16x1xf32, #tpu.memory_space<vmem>>, %arg3: memref<309x512xbf16, #tpu.memory_space<vmem>>, %arg4: memref<1x512xf32, #tpu.memory_space<vmem>>, %arg5: memref<1x512xf32, #tpu.memory_space<vmem>>, %arg6: memref<512x1024xbf16, #tpu.memory_space<vmem>>, %arg7: memref<1x1024xf32, #tpu.memory_space<vmem>>, %arg8: memref<1x1024xf32, #tpu.memory_space<vmem>>, %arg9: memref<1x1xf32, #tpu.memory_space<smem>>, %arg10: memref<1x16xf32, #tpu.memory_space<vmem>>) attributes {dimension_semantics = [#tpu.dimension_semantics<parallel>], iteration_bounds = array<i64: 1>, scalar_prefetch = 0 : i64, scratch_operands = 0 : i64, tpu.core_type = #tpu.core_type<tc>, window_params = [{transform_indices = @transform_0, window_bounds = array<i64: 16, 309>}, {transform_indices = @transform_1, window_bounds = array<i64: 16, 1>}, {pipeline_mode = #tpu.pipeline_mode<synchronous>, transform_indices = @transform_2, window_bounds = array<i64: 309, 512>}, {pipeline_mode = #tpu.pipeline_mode<synchronous>, transform_indices = @transform_3, window_bounds = array<i64: 1, 512>}, {pipeline_mode = #tpu.pipeline_mode<synchronous>, transform_indices = @transform_4, window_bounds = array<i64: 1, 512>}, {pipeline_mode = #tpu.pipeline_mode<synchronous>, transform_indices = @transform_5, window_bounds = array<i64: 512, 1024>}, {pipeline_mode = #tpu.pipeline_mode<synchronous>, transform_indices = @transform_6, window_bounds = array<i64: 1, 1024>}, {pipeline_mode = #tpu.pipeline_mode<synchronous>, transform_indices = @transform_7, window_bounds = array<i64: 1, 1024>}, {transform_indices = @transform_8, window_bounds = array<i64: 1, 1>}, {transform_indices = @transform_9, window_bounds = array<i64: 1, 16>}]} {
    %c0 = arith.constant 0 : index
    %c0_0 = arith.constant 0 : index
    %0 = vector.load %arg1[%c0, %c0_0] : memref<16x309xf32, #tpu.memory_space<vmem>>, vector<16x309xf32>
    %1 = arith.truncf %0 : vector<16x309xf32> to vector<16x309xbf16>
    %c0_1 = arith.constant 0 : index
    %c0_2 = arith.constant 0 : index
    %2 = vector.load %arg3[%c0_1, %c0_2] : memref<309x512xbf16, #tpu.memory_space<vmem>>, vector<309x512xbf16>
    %cst = arith.constant dense<0.000000e+00> : vector<16x512xf32>
    %3 = tpu.matmul %1, %2, %cst {dimension_numbers = #tpu.dot_dimension_numbers<[1], [0], [0], [1], [0, 0, 1, 1], [], []>} : vector<16x309xbf16>, vector<309x512xbf16>, vector<16x512xf32> -> vector<16x512xf32>
    %c0_3 = arith.constant 0 : index
    %c0_4 = arith.constant 0 : index
    %4 = vector.load %arg4[%c0_3, %c0_4] : memref<1x512xf32, #tpu.memory_space<vmem>>, vector<1x512xf32>
    %c0_5 = arith.constant 0 : index
    %c0_6 = arith.constant 0 : index
    %5 = vector.load %arg2[%c0_5, %c0_6] : memref<16x1xf32, #tpu.memory_space<vmem>>, vector<16x1xf32>
    %c0_7 = arith.constant 0 : index
    %c0_8 = arith.constant 0 : index
    %6 = vector.load %arg5[%c0_7, %c0_8] : memref<1x512xf32, #tpu.memory_space<vmem>>, vector<1x512xf32>
    %7 = vector.broadcast %5 : vector<16x1xf32> to vector<16x512xf32>
    %8 = vector.broadcast %6 : vector<1x512xf32> to vector<16x512xf32>
    %9 = arith.mulf %7, %8 : vector<16x512xf32>
    %10 = vector.broadcast %4 : vector<1x512xf32> to vector<16x512xf32>
    %11 = arith.addf %10, %9 : vector<16x512xf32>
    %12 = arith.addf %3, %11 : vector<16x512xf32>
    %cst_9 = arith.constant 0.000000e+00 : f32
    %13 = vector.broadcast %cst_9 : f32 to vector<16x512xf32>
    %14 = arith.cmpf ogt, %12, %13 : vector<16x512xf32>
    %cst_10 = arith.constant 2.000000e-01 : f32
    %15 = vector.broadcast %cst_10 : f32 to vector<16x512xf32>
    %16 = arith.mulf %15, %12 : vector<16x512xf32>
    %17 = arith.select %14, %12, %16 : vector<16x512xi1>, vector<16x512xf32>
    %18 = arith.truncf %17 : vector<16x512xf32> to vector<16x512xbf16>
    %c0_11 = arith.constant 0 : index
    %c0_12 = arith.constant 0 : index
    %19 = vector.load %arg6[%c0_11, %c0_12] : memref<512x1024xbf16, #tpu.memory_space<vmem>>, vector<512x1024xbf16>
    %cst_13 = arith.constant dense<0.000000e+00> : vector<16x1024xf32>
    %20 = tpu.matmul %18, %19, %cst_13 {dimension_numbers = #tpu.dot_dimension_numbers<[1], [0], [0], [1], [0, 0, 1, 1], [], []>} : vector<16x512xbf16>, vector<512x1024xbf16>, vector<16x1024xf32> -> vector<16x1024xf32>
    %c0_14 = arith.constant 0 : index
    %c0_15 = arith.constant 0 : index
    %21 = vector.load %arg7[%c0_14, %c0_15] : memref<1x1024xf32, #tpu.memory_space<vmem>>, vector<1x1024xf32>
    %22 = vector.broadcast %21 : vector<1x1024xf32> to vector<16x1024xf32>
    %23 = arith.addf %20, %22 : vector<16x1024xf32>
    %cst_16 = arith.constant 0.000000e+00 : f32
    %24 = vector.broadcast %cst_16 : f32 to vector<16x1024xf32>
    %25 = arith.cmpf ogt, %23, %24 : vector<16x1024xf32>
    %cst_17 = arith.constant 2.000000e-01 : f32
    %26 = vector.broadcast %cst_17 : f32 to vector<16x1024xf32>
    %27 = arith.mulf %26, %23 : vector<16x1024xf32>
    %28 = arith.select %25, %23, %27 : vector<16x1024xi1>, vector<16x1024xf32>
    %c0_18 = arith.constant 0 : index
    %c0_19 = arith.constant 0 : index
    %29 = vector.load %arg8[%c0_18, %c0_19] : memref<1x1024xf32, #tpu.memory_space<vmem>>, vector<1x1024xf32>
    %cst_20 = arith.constant dense<0.000000e+00> : vector<1x16xf32>
    %30 = tpu.matmul %29, %28, %cst_20 {dimension_numbers = #tpu.dot_dimension_numbers<[1], [1], [0], [0], [0, 0, 1, 0], [], []>} : vector<1x1024xf32>, vector<16x1024xf32>, vector<1x16xf32> -> vector<1x16xf32>
    %c0_21 = arith.constant 0 : index
    %c0_22 = arith.constant 0 : index
    %31 = memref.load %arg9[%c0_21, %c0_22] : memref<1x1xf32, #tpu.memory_space<smem>>
    %32 = vector.broadcast %31 : f32 to vector<1x16xf32>
    %33 = arith.addf %30, %32 : vector<1x16xf32>
    %cst_23 = arith.constant 0.000000e+00 : f32
    %34 = vector.broadcast %cst_23 : f32 to vector<1x16xf32>
    %35 = arith.cmpf oge, %33, %34 : vector<1x16xf32>
    %cst_24 = arith.constant 0.000000e+00 : f32
    %36 = vector.broadcast %cst_24 : f32 to vector<1x16xf32>
    %37 = arith.subf %36, %33 : vector<1x16xf32>
    %38 = arith.select %35, %37, %33 : vector<1x16xi1>, vector<1x16xf32>
    %39 = math.exp %38 : vector<1x16xf32>
    %cst_25 = arith.constant 1.000000e+00 : f32
    %40 = vector.broadcast %cst_25 : f32 to vector<1x16xf32>
    %41 = arith.select %35, %40, %39 : vector<1x16xi1>, vector<1x16xf32>
    %cst_26 = arith.constant 1.000000e+00 : f32
    %42 = vector.broadcast %cst_26 : f32 to vector<1x16xf32>
    %43 = arith.addf %42, %39 : vector<1x16xf32>
    %44 = tpu.reciprocal %43 {approx = true} : vector<1x16xf32> -> vector<1x16xf32>
    %45 = arith.mulf %41, %44 : vector<1x16xf32>
    %c0_27 = arith.constant 0 : index
    %c0_28 = arith.constant 0 : index
    %46 = vector.load %arg10[%c0_27, %c0_28] : memref<1x16xf32, #tpu.memory_space<vmem>>, vector<1x16xf32>
    tpu.vector_store %arg10[%c0_27, %c0_28], %45 {strides = array<i32>} : memref<1x16xf32, #tpu.memory_space<vmem>>, vector<1x16xf32>,
    return
  }
  func.func @transform_0(%arg0: i32) -> (i32, i32) {
    %c0_i32 = arith.constant 0 : i32
    %c0_i32_0 = arith.constant 0 : i32
    return %arg0, %c0_i32 : i32, i32
  }
  func.func @transform_1(%arg0: i32) -> (i32, i32) {
    %c0_i32 = arith.constant 0 : i32
    %c0_i32_0 = arith.constant 0 : i32
    return %arg0, %c0_i32 : i32, i32
  }
  func.func @transform_2(%arg0: i32) -> (i32, i32) {
    %c0_i32 = arith.constant 0 : i32
    %c0_i32_0 = arith.constant 0 : i32
    %c0_i32_1 = arith.constant 0 : i32
    return %c0_i32, %c0_i32_0 : i32, i32
  }
  func.func @transform_3(%arg0: i32) -> (i32, i32) {
    %c0_i32 = arith.constant 0 : i32
    %c0_i32_0 = arith.constant 0 : i32
    %c0_i32_1 = arith.constant 0 : i32
    return %c0_i32, %c0_i32_0 : i32, i32
  }
  func.func @transform_4(%arg0: i32) -> (i32, i32) {
    %c0_i32 = arith.constant 0 : i32
    %c0_i32_0 = arith.constant 0 : i32
    %c0_i32_1 = arith.constant 0 : i32
    return %c0_i32, %c0_i32_0 : i32, i32
  }
  func.func @transform_5(%arg0: i32) -> (i32, i32) {
    %c0_i32 = arith.constant 0 : i32
    %c0_i32_0 = arith.constant 0 : i32
    %c0_i32_1 = arith.constant 0 : i32
    return %c0_i32, %c0_i32_0 : i32, i32
  }
  func.func @transform_6(%arg0: i32) -> (i32, i32) {
    %c0_i32 = arith.constant 0 : i32
    %c0_i32_0 = arith.constant 0 : i32
    %c0_i32_1 = arith.constant 0 : i32
    return %c0_i32, %c0_i32_0 : i32, i32
  }
  func.func @transform_7(%arg0: i32) -> (i32, i32) {
    %c0_i32 = arith.constant 0 : i32
    %c0_i32_0 = arith.constant 0 : i32
    %c0_i32_1 = arith.constant 0 : i32
    return %c0_i32, %c0_i32_0 : i32, i32
  }
  func.func @transform_8(%arg0: i32) -> (i32, i32) {
    %c0_i32 = arith.constant 0 : i32
    %c0_i32_0 = arith.constant 0 : i32
    %c0_i32_1 = arith.constant 0 : i32
    return %c0_i32, %c0_i32_0 : i32, i32
  }
  func.func @transform_9(%arg0: i32) -> (i32, i32) {
    %c0_i32 = arith.constant 0 : i32
    %c0_i32_0 = arith.constant 0 : i32
    return %arg0, %c0_i32 : i32, i32
  }
}

</mosaic_0001>

<bundles_post_ra>
// kernel: discriminator_forward.1
= control target key start
LH: loop header
LB: loop body
LE: loop exit
PB: predicated region body
PF: predicated region fallthrough
CT: control target
= control target key end

     0   :  { %15 = vsyncpa [#allocation4], 0  ;;  %s4086_s0 = inlined_call_operand.hbm [shape: f32[16,309], index: 0, kind: input, shape index: {}]   ;;  %s4087_s1 = inlined_call_operand.vmem [shape: f32[16,1], index: 1, kind: input, shape index: {}]   ;;  %s4088_s2 = inlined_call_operand.hbm [shape: bf16[309,512], index: 2, kind: input, shape index: {}]   ;;  %s4089_s3 = inlined_call_operand.vmem [shape: f32[1,512], index: 3, kind: input, shape index: {}]   ;;  %s4090_s4 = inlined_call_operand.vmem [shape: f32[1,512], index: 4, kind: input, shape index: {}]   ;;  %s4091_s5 = inlined_call_operand.hbm [shape: bf16[512,1024], index: 5, kind: input, shape index: {}]   ;;  %s4092_s6 = inlined_call_operand.vmem [shape: f32[1,1024], index: 6, kind: input, shape index: {}]   ;;  %s4093_s7 = inlined_call_operand.vmem [shape: f32[1,1024], index: 7, kind: input, shape index: {}]   ;;  %s4094_s8 = inlined_call_operand.<no memory space> [shape: f32[1,1], index: 8, kind: input, shape index: {}]   ;;  %s4095_s9 = inlined_call_operand.hbm [shape: f32[1,16], index: 9, kind: output, shape index: {}]  }
   0x1   :  { %16 = vsyncpa [#allocation7], 0 }
   0x2   :  { %17 = vsyncpa [#allocation5], 0  ;;  %s3804_s30 = smov [#allocation6]   ;;  %s3710_s13 = scalar_lea.hbm %s4088_s2, 9984 }
   0x3   :  { %s37_s10 = sshll.u32 %s3804_s30, 4  ;;  %p3711_p0 = scmp.ne.s32.totalorder %s4088_s2, %s3710_s13  ;;  %s38_s10 = int_to_ptr.vmem [resolvable:$true] %s37_s10 }
   0x4   :  { %p3714_p1 = scmp.lt.u32.totalorder %s3710_s13, %s4088_s2 }
   0x6   :  { %p3716_p2 = pnand %p3714_p1, %p3711_p0 }
   0x8   :  { %3719 = shalt.err (!%p3716_p2)
}
   0x9   :  { %s3720_s18 = scalar_lea.vmem %s38_s10, 9984  ;;  %p3725_p4 = scmp.lt.s32.totalorder %s38_s10, %s38_s10 }
   0xa   :  { %p3721_p3 = scmp.ne.s32.totalorder %s38_s10, %s3720_s18  ;;  %p3726_p5 = scmp.lt.s32.totalorder %s3720_s18, %s3720_s18 }
   0xc   :  { %p3727_p6 = por %p3726_p5, %p3725_p4 }
   0xe   :  { %p3728_p7 = pnand %p3727_p6, %p3721_p3 }
  0x10   :  { %3731 = shalt.err (!%p3728_p7)
}
  0x11   :  { %s3805_s19 = smov 256   ;;  %s3806_s20 = smov 16  }
  0x12   :  { %43 = dma.hbm_to_vmem [thread:$0]  %s4088_s2, 9984, %s38_s10, [#allocation7], %s3805_s19, %s3805_s19, %s3806_s20  }
  0x13   :  { %s3807_s23 = smov [#allocation3]   ;;  %s3732_s27 = scalar_lea.hbm %s4086_s0, 768 }
  0x14   :  { %s23_s24 = sshll.u32 %s3807_s23, 4  ;;  %p3733_p8 = scmp.ne.s32.totalorder %s4086_s0, %s3732_s27  ;;  %s24_s24 = int_to_ptr.vmem [resolvable:$true] %s23_s24 }
  0x15   :  { %p3736_p9 = scmp.lt.u32.totalorder %s3732_s27, %s4086_s0 }
  0x17   :  { %p3738_p10 = pnand %p3736_p9, %p3733_p8 }
  0x19   :  { %3741 = shalt.err (!%p3738_p10)
}
  0x1a   :  { %s3742_s12 = scalar_lea.vmem %s24_s24, 768  ;;  %p3747_p12 = scmp.lt.s32.totalorder %s24_s24, %s24_s24 }
  0x1b   :  { %p3743_p11 = scmp.ne.s32.totalorder %s24_s24, %s3742_s12  ;;  %p3748_p13 = scmp.lt.s32.totalorder %s3742_s12, %s3742_s12 }
  0x1d   :  { %p3749_p0 = por %p3748_p13, %p3747_p12 }
  0x1f   :  { %p3750_p1 = pnand %p3749_p0, %p3743_p11 }
  0x21   :  { %3753 = shalt.err (!%p3750_p1)
}
  0x22   :  { %s3808_s2 = smov 384   ;;  %s3809_s10 = smov 24  }
  0x23   :  { %29 = dma.hbm_to_vmem [thread:$0]  %s4086_s0, 768, %s24_s24, [#allocation4], %s3808_s2, %s3808_s2, %s3809_s10  }
  0x24   :  { %s3810_s15 = smov [#allocation8]   ;;  %s3754_s19 = scalar_lea.hbm %s4091_s5, 32768 }
  0x25   :  { %s53_s16 = sshll.u32 %s3810_s15, 4  ;;  %p3755_p2 = scmp.ne.s32.totalorder %s4091_s5, %s3754_s19  ;;  %s54_s16 = int_to_ptr.vmem [resolvable:$true] %s53_s16 }
  0x26   :  { %p3758_p3 = scmp.lt.u32.totalorder %s3754_s19, %s4091_s5 }
  0x28   :  { %p3760_p4 = pnand %p3758_p3, %p3755_p2 }
  0x2a   :  { %3763 = shalt.err (!%p3760_p4)
}
  0x2b   :  { %s3764_s25 = scalar_lea.vmem %s54_s16, 32768  ;;  %p3769_p6 = scmp.lt.s32.totalorder %s54_s16, %s54_s16 }
  0x2c   :  { %p3765_p5 = scmp.ne.s32.totalorder %s54_s16, %s3764_s25  ;;  %p3770_p7 = scmp.lt.s32.totalorder %s3764_s25, %s3764_s25 }
  0x2e   :  { %p3771_p8 = por %p3770_p7, %p3769_p6 }
  0x30   :  { %p3772_p9 = pnand %p3771_p8, %p3765_p5 }
  0x32   :  { %3775 = shalt.err (!%p3772_p9)
}
  0x33   :  { %s3811_s0 = smov 512   ;;  %s3812_s24 = smov 32  }
  0x34   :  { %59 = dma.hbm_to_vmem [thread:$0]  %s4091_s5, 32768, %s54_s16, [#allocation7], %s3811_s0, %s3811_s0, %s3812_s24  }
  0x35   :  { %3798 = dma.done.wait [#allocation4], 768  }
  0x36   :  { %3799 = vsyncadd [#allocation4], 4294966528 }
  0x37   :  { %3800 = dma.done.wait [#allocation7], 42752  }
  0x38   :  { %3801 = vsyncadd [#allocation7], 4294924544  ;;  %v3813_v0 = vmov 0   ;;  %v3588_v1 = vld [vmem:[#allocation6 + $0x4] ss:$16 sps:$4 sm:$0xff]   ;;  %vm629_vm0 = vcmask 1041408  }
  0x39   :  { %720 = vmatprep.mubr.bf16.mxu1 %v3813_v0  ;;  %3587 = vset.pattern.permute.xlu0 %v3813_v0  ;;  %v3590_v2 = vld [vmem:[#allocation6 + $0x204] ss:$16 sps:$4 sm:$0xff]   ;;  %v3592_v3 = vld [vmem:[#allocation6] ss:$16 sps:$4 sm:$0xff]   ;;  %vm630_vm1 = vcmask 1042432   ;;  %v3814_v10 = vmov 65535  }
  0x3a   :  { %645 = vmatprep.subr.bf16.mxu0 %v3588_v1  ;;  %v3593_v4 = vld [vmem:[#allocation6 + $0x200] ss:$16 sps:$4 sm:$0xff]   ;;  %688 = vmatprep.subr.bf16.mxu1 %v3590_v2  ;;  %v3594_v5 = vld [vmem:[#allocation6 + $0x24] ss:$16 sps:$4 sm:$0xff]   ;;  %v631_v11 = vsel %vm629_vm0, 4294967295, %v3814_v10  ;;  %v81_v25 = vld [vmem:[#allocation3 + $0x28] sm:$0xff] }
  0x3b   :  { %646 = vmatpush1.bf16.msra.mxu0 %v3592_v3  ;;  %689 = vmatpush1.bf16.msra.mxu1 %v3593_v4  ;;  %v3596_v6 = vld [vmem:[#allocation6 + $0x224] ss:$16 sps:$4 sm:$0xff]   ;;  %v3598_v7 = vld [vmem:[#allocation6 + $0x20] ss:$16 sps:$4 sm:$0xff]   ;;  %v3904_v17 = vsel %vm630_vm1, %v631_v11, 0  ;;  %vm625_vm2 = vcmask 433152  }
  0x3c   :  { %647 = vmatprep.subr.bf16.mxu0 %v3594_v5  ;;  %v3599_v8 = vld [vmem:[#allocation6 + $0x220] ss:$16 sps:$4 sm:$0xff]   ;;  %690 = vmatprep.subr.bf16.mxu1 %v3596_v6  ;;  %v3600_v9 = vld [vmem:[#allocation6 + $0x44] ss:$16 sps:$4 sm:$0xff]   ;;  %v3615_v26 = vld [vmem:[#allocation6 + $0xc] ss:$16 sps:$4 sm:$0xff]  }
  0x3d   :  { %v3602_v12 = vld [vmem:[#allocation6 + $0x244] ss:$16 sps:$4 sm:$0xff]   ;;  %v3604_v13 = vld [vmem:[#allocation6 + $0x40] ss:$16 sps:$4 sm:$0xff]   ;;  %v3613_v27 = vld [vmem:[#allocation6 + $0x8] ss:$16 sps:$4 sm:$0xff]  }
  0x3e   :  { %v3605_v14 = vld [vmem:[#allocation6 + $0x240] ss:$16 sps:$4 sm:$0xff]   ;;  %v3606_v15 = vld [vmem:[#allocation6 + $0x64] ss:$16 sps:$4 sm:$0xff]   ;;  %v3621_v31 = vld [vmem:[#allocation6 + $0x2c] ss:$16 sps:$4 sm:$0xff]  }
  0x3f   :  { %648 = vmatpush1.bf16.msra.mxu0 %v3598_v7  ;;  %691 = vmatpush1.bf16.msra.mxu1 %v3599_v8  ;;  %v161_v16 = vld [vmem:[#allocation6 + $0x260] sm:$0x77]  ;;  %v3619_v32 = vld [vmem:[#allocation6 + $0x28] ss:$16 sps:$4 sm:$0xff]   ;;  %v3627_v35 = vld [vmem:[#allocation6 + $0x4c] ss:$16 sps:$4 sm:$0xff]  }
  0x40   :  { %649 = vmatprep.subr.bf16.mxu0 %v3600_v9  ;;  %692 = vmatprep.subr.bf16.mxu1 %v3602_v12  ;;  %v3243_v18 = vcombine.high %v161_v16, %v161_v16  ;;  %v3242_v19 = vcombine.low %v161_v16, %v161_v16  ;;  %v3609_v20 = vld [vmem:[#allocation6 + $0x60] ss:$16 sps:$4 sm:$0xff]   ;;  %v3611_v23 = vld [vmem:[#allocation6 + $0x84] ss:$16 sps:$4 sm:$0xff]   ;;  %v3625_v36 = vld [vmem:[#allocation6 + $0x48] ss:$16 sps:$4 sm:$0xff]  }
  0x41   :  { %v78_v24 = vld [vmem:[#allocation3 + $0x10] sm:$0xff]  ;;  %v3633_v39 = vld [vmem:[#allocation6 + $0x6c] ss:$16 sps:$4 sm:$0xff]   ;;  %v3631_v40 = vld [vmem:[#allocation6 + $0x68] ss:$16 sps:$4 sm:$0xff]   ;;  %s3815_s14 = smov [#allocation9]  }
  0x42   :  { %v637_v21 = vand.u32 %v3243_v18, %v3904_v17  ;;  %v634_v22 = vand.u32 %v3242_v19, %v3904_v17  ;;  %v3908_v28 = vpack.c.bf16 %v81_v25, %v78_v24  ;;  %v3616_v29 = vld [vmem:[#allocation6 + $0x80] ss:$16 sps:$4 sm:$0xff]   ;;  %v3617_v30 = vld [vmem:[#allocation6 + $0xa4] ss:$16 sps:$4 sm:$0xff]   ;;  %v3639_v43 = vld [vmem:[#allocation6 + $0x8c] ss:$16 sps:$4 sm:$0xff]  }
  0x43   :  { %650 = vmatpush1.bf16.msra.mxu0 %v3604_v13  ;;  %693 = vmatpush1.bf16.msra.mxu1 %v3605_v14  ;;  %v3622_v33 = vld [vmem:[#allocation6 + $0xa0] ss:$16 sps:$4 sm:$0xff]   ;;  %v3623_v34 = vld [vmem:[#allocation6 + $0xc4] ss:$16 sps:$4 sm:$0xff]   ;;  %v3637_v44 = vld [vmem:[#allocation6 + $0x88] ss:$16 sps:$4 sm:$0xff]  }
  0x44   :  { %651 = vmatprep.subr.bf16.mxu0 %v3606_v15  ;;  %694 = vmatprep.subr.bf16.mxu1 %v637_v21  ;;  %v3628_v37 = vld [vmem:[#allocation6 + $0xc0] ss:$16 sps:$4 sm:$0xff]   ;;  %v3629_v38 = vld [vmem:[#allocation6 + $0xe4] ss:$16 sps:$4 sm:$0xff]   ;;  %v3645_v47 = vld [vmem:[#allocation6 + $0xac] ss:$16 sps:$4 sm:$0xff]  }
  0x45   :  { %v3634_v41 = vld [vmem:[#allocation6 + $0xe0] ss:$16 sps:$4 sm:$0xff]   ;;  %v3635_v42 = vld [vmem:[#allocation6 + $0x104] ss:$16 sps:$4 sm:$0xff]   ;;  %v3643_v48 = vld [vmem:[#allocation6 + $0xa8] ss:$16 sps:$4 sm:$0xff]  }
  0x46   :  { %v3640_v45 = vld [vmem:[#allocation6 + $0x100] ss:$16 sps:$4 sm:$0xff]   ;;  %v3641_v46 = vld [vmem:[#allocation6 + $0x124] ss:$16 sps:$4 sm:$0xff]   ;;  %v3651_v51 = vld [vmem:[#allocation6 + $0xcc] ss:$16 sps:$4 sm:$0xff]  }
  0x47   :  { %652 = vmatpush1.bf16.msra.mxu0 %v3609_v20  ;;  %695 = vmatpush1.bf16.msra.mxu1 %v634_v22  ;;  %v3646_v49 = vld [vmem:[#allocation6 + $0x120] ss:$16 sps:$4 sm:$0xff]   ;;  %v3647_v50 = vld [vmem:[#allocation6 + $0x144] ss:$16 sps:$4 sm:$0xff]   ;;  %v3649_v52 = vld [vmem:[#allocation6 + $0xc8] ss:$16 sps:$4 sm:$0xff]  }
  0x48   :  { %653 = vmatprep.subr.bf16.mxu0 %v3611_v23  ;;  %731 = vmatprep.subr.bf16.mxu1 %v3615_v26  ;;  %v3652_v53 = vld [vmem:[#allocation6 + $0x140] ss:$16 sps:$4 sm:$0xff]   ;;  %v3653_v54 = vld [vmem:[#allocation6 + $0x164] ss:$16 sps:$4 sm:$0xff]   ;;  %v3657_v55 = vld [vmem:[#allocation6 + $0xec] ss:$16 sps:$4 sm:$0xff]  }
  0x49   :  { %v77_v56 = vld [vmem:[#allocation3 + $0x8] sm:$0xff]  ;;  %v80_v57 = vld [vmem:[#allocation3 + $0x20] sm:$0xff]  ;;  %v79_v20 = vld [vmem:[#allocation3 + $0x18] sm:$0xff]  ;;  %s3156_s15 = sshll.u32 %s3815_s14, 4  ;;  %s3157_s15 = int_to_ptr.vmem [resolvable:$true] %s3156_s15 }
  0x4a   :  { %3246 = vmatmul.mubr.msk.bf16.vlgmr.msra.gmra.mrb[0].mxu1 %vm625_vm2, %v3908_v28  ;;  %v3655_v58 = vld [vmem:[#allocation6 + $0xe8] ss:$16 sps:$4 sm:$0xff]   ;;  %v83_v59 = vpack.c.bf16 %v80_v57, %v77_v56  ;;  %v3658_v60 = vld [vmem:[#allocation6 + $0x160] ss:$16 sps:$4 sm:$0xff]   ;;  %v3659_v61 = vld [vmem:[#allocation6 + $0x184] ss:$16 sps:$4 sm:$0xff]   ;;  %p3781_p11 = scmp.lt.s32.totalorder %s3157_s15, %s3157_s15 }
  0x4b   :  { %654 = vmatpush1.bf16.msra.mxu0 %v3616_v29  ;;  %732 = vmatpush1.bf16.msra.mxu1 %v3613_v27  ;;  %v3663_v62 = vld [vmem:[#allocation6 + $0x10c] ss:$16 sps:$4 sm:$0xff]   ;;  %v3661_v63 = vld [vmem:[#allocation6 + $0x108] ss:$16 sps:$4 sm:$0xff]   ;;  %v3664_v1 = vld [vmem:[#allocation6 + $0x180] ss:$16 sps:$4 sm:$0xff]  }
  0x4c   :  { %655 = vmatprep.subr.bf16.mxu0 %v3617_v30  ;;  %733 = vmatprep.subr.bf16.mxu1 %v3621_v31  ;;  %v3665_v2 = vld [vmem:[#allocation6 + $0x1a4] ss:$16 sps:$4 sm:$0xff]   ;;  %v3669_v3 = vld [vmem:[#allocation6 + $0x12c] ss:$16 sps:$4 sm:$0xff]   ;;  %v3667_v4 = vld [vmem:[#allocation6 + $0x128] ss:$16 sps:$4 sm:$0xff]  }
  0x4d   :  { %677 = vmatprep.mubr.bf16.mxu0 %v83_v59  ;;  %763 = vmatprep.mubr.bf16.mxu1 %v83_v59  ;;  %v3670_v5 = vld [vmem:[#allocation6 + $0x1a0] ss:$16 sps:$4 sm:$0xff]   ;;  %v3671_v6 = vld [vmem:[#allocation6 + $0x1c4] ss:$16 sps:$4 sm:$0xff]   ;;  %v3675_v7 = vld [vmem:[#allocation6 + $0x14c] ss:$16 sps:$4 sm:$0xff]  }
  0x4e   :  { %v164_v8 = vld [vmem:[%s4087_s1] sm:$0xff]  ;;  %v165_v9 = vld [vmem:[%s4087_s1 + $0x8] sm:$0xff]  ;;  %s3780_s16 = scalar_lea.vmem %s3157_s15, 32 }
  0x4f   :  { %656 = vmatpush1.bf16.msra.mxu0 %v3622_v33  ;;  %734 = vmatpush1.bf16.msra.mxu1 %v3619_v32  ;;  %v3673_v10 = vld [vmem:[#allocation6 + $0x148] ss:$16 sps:$4 sm:$0xff]   ;;  %v3676_v11 = vld [vmem:[#allocation6 + $0x1c0] ss:$16 sps:$4 sm:$0xff]   ;;  %v3677_v12 = vld [vmem:[#allocation6 + $0x1e4] ss:$16 sps:$4 sm:$0xff]  }
  0x50   :  { %657 = vmatprep.subr.bf16.mxu0 %v3623_v34  ;;  %735 = vmatprep.subr.bf16.mxu1 %v3627_v35  ;;  %v3681_v13 = vld [vmem:[#allocation6 + $0x16c] ss:$16 sps:$4 sm:$0xff]   ;;  %v845_v14 = vld [vmem:[#allocation8] sm:$0xff]  ;;  %v3679_v16 = vld [vmem:[#allocation6 + $0x168] ss:$16 sps:$4 sm:$0xff]  }
  0x51   :  { %169 = vperm.xlu0 %3587, %v164_v8   ;;  %v849_v15 = vld [vmem:[#allocation8 + $0x20] sm:$0xff]  ;;  %v3685_v21 = vld [vmem:[#allocation6 + $0x18c] ss:$16 sps:$4 sm:$0xff]   ;;  %v3683_v26 = vld [vmem:[#allocation6 + $0x188] ss:$16 sps:$4 sm:$0xff]  }
  0x52   :  { %v3682_v18 = vld [vmem:[#allocation6 + $0x1e0] ss:$16 sps:$4 sm:$0xff]   ;;  %v3249_v22 = vcombine.high %v845_v14, %v849_v15  ;;  %v3248_v27 = vcombine.low %v845_v14, %v849_v15  ;;  %v3688_v29 = vld [vmem:[#allocation6 + $0x1ac] ss:$16 sps:$4 sm:$0xff]   ;;  %v3686_v33 = vld [vmem:[#allocation6 + $0x1a8] ss:$16 sps:$4 sm:$0xff]  }
  0x53   :  { %658 = vmatpush1.bf16.msra.mxu0 %v3628_v37  ;;  %736 = vmatpush1.bf16.msra.mxu1 %v3625_v36  ;;  %v76_v19 = vld [vmem:[#allocation3] sm:$0xff]  ;;  %v3691_v35 = vld [vmem:[#allocation6 + $0x1cc] ss:$16 sps:$4 sm:$0xff]  }
  0x54   :  { %659 = vmatprep.subr.bf16.mxu0 %v3629_v38  ;;  %737 = vmatprep.subr.bf16.mxu1 %v3633_v39  ;;  %v853_v23 = vld [vmem:[#allocation8 + $0x40] sm:$0xff]  ;;  %v82_v25 = vpack.c.bf16 %v79_v20, %v76_v19  ;;  %v3689_v39 = vld [vmem:[#allocation6 + $0x1c8] ss:$16 sps:$4 sm:$0xff]   ;;  %v3703_v59 = vld [vmem:[#allocation6 + $0x24c] ss:$16 sps:$4 sm:$0xff]  }
  0x55   :  { %174 = vperm.xlu0 %3587, %v165_v9   ;;  %v857_v24 = vld [vmem:[#allocation8 + $0x60] sm:$0xff]  ;;  %v858_v14 = vld [vmem:[#allocation8 + $0x68] sm:$0xff] }
  0x56   :  { %v3257_v30 = vcombine.high %v853_v23, %v857_v24  ;;  %v861_v31 = vld [vmem:[#allocation8 + $0x80] sm:$0xff]  ;;  %v3256_v34 = vcombine.low %v853_v23, %v857_v24  ;;  %v862_v20 = vld [vmem:[#allocation8 + $0x88] sm:$0xff] }
  0x57   :  { %660 = vmatpush1.bf16.msra.mxu0 %v3634_v41  ;;  %738 = vmatpush1.bf16.msra.mxu1 %v3631_v40  ;;  %v865_v32 = vld [vmem:[#allocation8 + $0xa0] sm:$0xff]  ;;  %v3694_v41 = vld [vmem:[#allocation6 + $0x1ec] ss:$16 sps:$4 sm:$0xff]  }
  0x58   :  { %661 = vmatprep.subr.bf16.mxu0 %v3635_v42  ;;  %739 = vmatprep.subr.bf16.mxu1 %v3639_v43  ;;  %v3265_v36 = vcombine.high %v861_v31, %v865_v32  ;;  %v869_v37 = vld [vmem:[#allocation8 + $0xc0] sm:$0xff]  ;;  %v3264_v40 = vcombine.low %v861_v31, %v865_v32  ;;  %v870_v23 = vld [vmem:[#allocation8 + $0xc8] sm:$0xff] }
  0x59   :  { %v873_v38 = vld [vmem:[#allocation8 + $0xe0] sm:$0xff]  ;;  %v874_v24 = vld [vmem:[#allocation8 + $0xe8] sm:$0xff] }
  0x5a   :  { %v3273_v42 = vcombine.high %v869_v37, %v873_v38  ;;  %v877_v43 = vld [vmem:[#allocation8 + $0x100] sm:$0xff]  ;;  %v3275_v31 = vcombine.high %v870_v23, %v874_v24  ;;  %v878_v32 = vld [vmem:[#allocation8 + $0x108] sm:$0xff] }
  0x5b   :  { %662 = vmatpush1.bf16.msra.mxu0 %v3640_v45  ;;  %740 = vmatpush1.bf16.msra.mxu1 %v3637_v44  ;;  %v881_v44 = vld [vmem:[#allocation8 + $0x120] sm:$0xff]  ;;  %v3692_v45 = vld [vmem:[#allocation6 + $0x1e8] ss:$16 sps:$4 sm:$0xff]  }
  0x5c   :  { %663 = vmatprep.subr.bf16.mxu0 %v3641_v46  ;;  %741 = vmatprep.subr.bf16.mxu1 %v3645_v47  ;;  %v3272_v46 = vcombine.low %v869_v37, %v873_v38  ;;  %v3697_v47 = vld [vmem:[#allocation6 + $0x20c] ss:$16 sps:$4 sm:$0xff]   ;;  %v893_v56 = vld [vmem:[#allocation8 + $0x180] sm:$0xff] }
  0x5d   :  { %v897_v57 = vld [vmem:[#allocation8 + $0x1a0] sm:$0xff] }
  0x5e   :  { %v909_v8 = vld [vmem:[#allocation8 + $0x200] sm:$0xff] }
  0x5f   :  { %664 = vmatpush1.bf16.msra.mxu0 %v3646_v49  ;;  %742 = vmatpush1.bf16.msra.mxu1 %v3643_v48  ;;  %v3281_v48 = vcombine.high %v877_v43, %v881_v44  ;;  %v885_v49 = vld [vmem:[#allocation8 + $0x140] sm:$0xff] }
  0x60   :  { %665 = vmatprep.subr.bf16.mxu0 %v3647_v50  ;;  %743 = vmatprep.subr.bf16.mxu1 %v3651_v51  ;;  %v889_v50 = vld [vmem:[#allocation8 + $0x160] sm:$0xff]  ;;  %v3695_v51 = vld [vmem:[#allocation6 + $0x208] ss:$16 sps:$4 sm:$0xff]  }
  0x61   :  { %v913_v9 = vld [vmem:[#allocation8 + $0x220] sm:$0xff] }
  0x62   :  { %v3313_v15 = vcombine.high %v909_v8, %v913_v9  ;;  %v3312_v19 = vcombine.low %v909_v8, %v913_v9  ;;  %v937_v37 = vld [vmem:[#allocation8 + $0x2e0] sm:$0xff]  ;;  %v938_v8 = vld [vmem:[#allocation8 + $0x2e8] sm:$0xff] }
  0x63   :  { %666 = vmatpush1.bf16.msra.mxu0 %v3652_v53  ;;  %744 = vmatpush1.bf16.msra.mxu1 %v3649_v52  ;;  %v3700_v52 = vld [vmem:[#allocation6 + $0x22c] ss:$16 sps:$4 sm:$0xff]   ;;  %v3280_v53 = vcombine.low %v877_v43, %v881_v44  ;;  %v945_v43 = vld [vmem:[#allocation8 + $0x320] sm:$0xff] }
  0x64   :  { %667 = vmatprep.subr.bf16.mxu0 %v3653_v54  ;;  %745 = vmatprep.subr.bf16.mxu1 %v3657_v55  ;;  %v162_v54 = vld [vmem:[#allocation6 + $0x268] sm:$0x77]  ;;  %v3289_v55 = vcombine.high %v885_v49, %v889_v50  ;;  %v886_v44 = vld [vmem:[#allocation8 + $0x148] sm:$0xff] }
  0x67   :  { %668 = vmatpush1.bf16.msra.mxu0 %v3658_v60  ;;  %746 = vmatpush1.bf16.msra.mxu1 %v3655_v58  ;;  %v3698_v58 = vld [vmem:[#allocation6 + $0x228] ss:$16 sps:$4 sm:$0xff]   ;;  %v3245_v60 = vcombine.high %v162_v54, %v162_v54 }
  0x68   :  { %669 = vmatprep.subr.bf16.mxu0 %v3659_v61  ;;  %747 = vmatprep.subr.bf16.mxu1 %v3663_v62  ;;  %v3288_v61 = vcombine.low %v885_v49, %v889_v50  ;;  %v3297_v62 = vcombine.high %v893_v56, %v897_v57  ;;  %v894_v50 = vld [vmem:[#allocation8 + $0x188] sm:$0xff] }
  0x6b   :  { %670 = vmatpush1.bf16.msra.mxu0 %v3664_v1  ;;  %748 = vmatpush1.bf16.msra.mxu1 %v3661_v63  ;;  %v901_v63 = vld [vmem:[#allocation8 + $0x1c0] sm:$0xff] }
  0x6c   :  { %671 = vmatprep.subr.bf16.mxu0 %v3665_v2  ;;  %749 = vmatprep.subr.bf16.mxu1 %v3669_v3  ;;  %v905_v1 = vld [vmem:[#allocation8 + $0x1e0] sm:$0xff]  ;;  %v3701_v2 = vld [vmem:[#allocation6 + $0x248] ss:$16 sps:$4 sm:$0xff]   ;;  %v3244_v3 = vcombine.low %v162_v54, %v162_v54 }
  0x6f   :  { %672 = vmatpush1.bf16.msra.mxu0 %v3670_v5  ;;  %750 = vmatpush1.bf16.msra.mxu1 %v3667_v4  ;;  %v643_v4 = vand.u32 %v3245_v60, %v3904_v17  ;;  %v3296_v5 = vcombine.low %v893_v56, %v897_v57  ;;  %v906_v56 = vld [vmem:[#allocation8 + $0x1e8] sm:$0xff] }
  0x70   :  { %673 = vmatprep.subr.bf16.mxu0 %v3671_v6  ;;  %751 = vmatprep.subr.bf16.mxu1 %v3675_v7  ;;  %v846_v6 = vld [vmem:[#allocation8 + $0x8] sm:$0xff] }
  0x71   :  { %v850_v7 = vld [vmem:[#allocation8 + $0x28] sm:$0xff] }
  0x72   :  { %v914_v60 = vld [vmem:[#allocation8 + $0x228] sm:$0xff] }
  0x73   :  { %674 = vmatpush1.bf16.msra.mxu0 %v3676_v11  ;;  %752 = vmatpush1.bf16.msra.mxu1 %v3673_v10  ;;  %v640_v10 = vand.u32 %v3244_v3, %v3904_v17  ;;  %v3251_v11 = vcombine.high %v846_v6, %v850_v7 }
  0x74   :  { %675 = vmatprep.subr.bf16.mxu0 %v3677_v12  ;;  %753 = vmatprep.subr.bf16.mxu1 %v3681_v13  ;;  %v3304_v12 = vcombine.low %v901_v63, %v905_v1  ;;  %v854_v13 = vld [vmem:[#allocation8 + $0x48] sm:$0xff] }
  0x75   :  { %v3258_v17 = vcombine.low %v854_v13, %v858_v14 }
  0x77   :  { %676 = vmatpush1.bf16.msra.mxu0 %v3682_v18  ;;  %754 = vmatpush1.bf16.msra.mxu1 %v3679_v16  ;;  %v3250_v16 = vcombine.low %v846_v6, %v850_v7  ;;  %v3259_v18 = vcombine.high %v854_v13, %v858_v14 }
  0x78   :  { %755 = vmatprep.subr.bf16.mxu1 %v3685_v21  ;;  %2423 = vmatprep.subr.bf16.mxu0 %v3249_v22  ;;  %v866_v21 = vld [vmem:[#allocation8 + $0xa8] sm:$0xff] }
  0x79   :  { %v3267_v22 = vcombine.high %v862_v20, %v866_v21 }
  0x7a   :  { %678 = vmatmul.mubr.bf16.vlgmr.msra.gmra.mrb[0].mxu0 %v82_v25 }
  0x7b   :  { %756 = vmatpush1.bf16.msra.mxu1 %v3683_v26  ;;  %2424 = vmatpush1.bf16.msra.mxu0 %v3248_v27  ;;  %v921_v26 = vld [vmem:[#allocation8 + $0x260] sm:$0xff]  ;;  %v3266_v27 = vcombine.low %v862_v20, %v866_v21  ;;  %v954_v21 = vld [vmem:[#allocation8 + $0x368] sm:$0xff] }
  0x7c   :  { %757 = vmatprep.subr.bf16.mxu1 %v3688_v29  ;;  %2425 = vmatprep.subr.bf16.mxu0 %v3257_v30 }
  0x7f   :  { %758 = vmatpush1.bf16.msra.mxu1 %v3686_v33  ;;  %2426 = vmatpush1.bf16.msra.mxu0 %v3256_v34  ;;  %v925_v33 = vld [vmem:[#allocation8 + $0x280] sm:$0xff] }
  0x80   :  { %759 = vmatprep.subr.bf16.mxu1 %v3691_v35  ;;  %2427 = vmatprep.subr.bf16.mxu0 %v3265_v36  ;;  %v929_v34 = vld [vmem:[#allocation8 + $0x2a0] sm:$0xff]  ;;  %v882_v35 = vld [vmem:[#allocation8 + $0x128] sm:$0xff] }
  0x81   :  { %v933_v36 = vld [vmem:[#allocation8 + $0x2c0] sm:$0xff]  ;;  %v3328_v38 = vcombine.low %v925_v33, %v929_v34 }
  0x83   :  { %760 = vmatpush1.bf16.msra.mxu1 %v3689_v39  ;;  %2428 = vmatpush1.bf16.msra.mxu0 %v3264_v40  ;;  %v3274_v39 = vcombine.low %v870_v23, %v874_v24  ;;  %v3337_v40 = vcombine.high %v933_v36, %v937_v37  ;;  %v957_v24 = vld [vmem:[#allocation8 + $0x380] sm:$0xff] }
  0x84   :  { %761 = vmatprep.subr.bf16.mxu1 %v3694_v41  ;;  %2429 = vmatprep.subr.bf16.mxu0 %v3273_v42  ;;  %v3283_v41 = vcombine.high %v878_v32, %v882_v35  ;;  %v941_v42 = vld [vmem:[#allocation8 + $0x300] sm:$0xff] }
  0x87   :  { %762 = vmatpush1.bf16.msra.mxu1 %v3692_v45  ;;  %2430 = vmatpush1.bf16.msra.mxu0 %v3272_v46  ;;  %v890_v45 = vld [vmem:[#allocation8 + $0x168] sm:$0xff]  ;;  %v3336_v46 = vcombine.low %v933_v36, %v937_v37 }
  0x88   :  { %774 = vmatprep.subr.bf16.mxu1 %v3697_v47  ;;  %2431 = vmatprep.subr.bf16.mxu0 %v3281_v48  ;;  %v3282_v47 = vcombine.low %v878_v32, %v882_v35  ;;  %v3345_v48 = vcombine.high %v941_v42, %v945_v43  ;;  %v3291_v49 = vcombine.high %v886_v44, %v890_v45  ;;  %v966_v35 = vld [vmem:[#allocation8 + $0x3c8] sm:$0xff] }
  0x89   :  { %v970_v36 = vld [vmem:[#allocation8 + $0x3e8] sm:$0xff] }
  0x8a   :  { %764 = vmatmul.mubr.bf16.vlgmr.msra.gmra.mrb[4].mxu1 %v82_v25  ;;  %v917_v25 = vld [vmem:[#allocation8 + $0x240] sm:$0xff] }
  0x8b   :  { %775 = vmatpush1.bf16.msra.mxu1 %v3695_v51  ;;  %806 = vmatprep.mubr.bf16.mxu1 %v3813_v0  ;;  %v3305_v0 = vcombine.high %v901_v63, %v905_v1  ;;  %v3320_v29 = vcombine.low %v917_v25, %v921_v26  ;;  %v3321_v30 = vcombine.high %v917_v25, %v921_v26  ;;  %v898_v51 = vld [vmem:[#allocation8 + $0x1a8] sm:$0xff]  ;;  %v961_v25 = vld [vmem:[#allocation8 + $0x3a0] sm:$0xff] }
  0x8c   :  { %776 = vmatprep.subr.bf16.mxu1 %v3700_v52  ;;  %2432 = vmatpush1.bf16.msra.mxu0 %v3280_v53  ;;  %v3344_v52 = vcombine.low %v941_v42, %v945_v43  ;;  %v3290_v53 = vcombine.low %v886_v44, %v890_v45  ;;  %v3299_v54 = vcombine.high %v894_v50, %v898_v51  ;;  %v918_v63 = vld [vmem:[#allocation8 + $0x248] sm:$0xff] }
  0x8d   :  { %2433 = vmatprep.subr.bf16.mxu0 %v3289_v55  ;;  %v902_v55 = vld [vmem:[#allocation8 + $0x1c8] sm:$0xff]  ;;  %v3298_v57 = vcombine.low %v894_v50, %v898_v51  ;;  %v3947_v51 = vld [vmem:[%s4090_s4] sm:$0xf] }
  0x8e   :  { %v922_v1 = vld [vmem:[#allocation8 + $0x268] sm:$0xff] }
  0x8f   :  { %777 = vmatpush1.bf16.msra.mxu1 %v3698_v58  ;;  %v3307_v58 = vcombine.high %v902_v55, %v906_v56  ;;  %v3323_v3 = vcombine.high %v918_v63, %v922_v1  ;;  %v3322_v6 = vcombine.low %v918_v63, %v922_v1  ;;  %v958_v26 = vld [vmem:[#allocation8 + $0x388] sm:$0xff] }
  0x90   :  { %778 = vmatprep.subr.bf16.mxu1 %v3703_v59  ;;  %2434 = vmatpush1.bf16.msra.mxu0 %v3288_v61  ;;  %v910_v59 = vld [vmem:[#allocation8 + $0x208] sm:$0xff]  ;;  %v3306_v61 = vcombine.low %v902_v55, %v906_v56 }
  0x91   :  { %2435 = vmatprep.subr.bf16.mxu0 %v3297_v62  ;;  %v3315_v62 = vcombine.high %v910_v59, %v914_v60  ;;  %v3927_v42 = vld [vmem:[#allocation8 + $0x408] sm:$0xff] }
  0x92   :  { %v3931_v44 = vld [vmem:[#allocation8 + $0x428] sm:$0xff] }
  0x93   :  { %779 = vmatpush1.bf16.msra.mxu1 %v3701_v2  ;;  %v3314_v2 = vcombine.low %v910_v59, %v914_v60 }
  0x94   :  { %780 = vmatprep.subr.bf16.mxu1 %v643_v4  ;;  %2436 = vmatpush1.bf16.msra.mxu0 %v3296_v5  ;;  %v926_v4 = vld [vmem:[#allocation8 + $0x288] sm:$0xff] }
  0x95   :  { %2437 = vmatprep.subr.bf16.mxu0 %v3305_v0  ;;  %v930_v5 = vld [vmem:[#allocation8 + $0x2a8] sm:$0xff] }
  0x96   :  { %v3331_v7 = vcombine.high %v926_v4, %v930_v5  ;;  %v934_v0 = vld [vmem:[#allocation8 + $0x2c8] sm:$0xff]  ;;  %v3330_v9 = vcombine.low %v926_v4, %v930_v5 }
  0x97   :  { %781 = vmatpush1.bf16.msra.mxu1 %v640_v10  ;;  %v3339_v10 = vcombine.high %v934_v0, %v938_v8  ;;  %v3338_v13 = vcombine.low %v934_v0, %v938_v8 }
  0x98   :  { %2509 = vmatprep.subr.bf16.mxu1 %v3251_v11  ;;  %2438 = vmatpush1.bf16.msra.mxu0 %v3304_v12  ;;  %v942_v11 = vld [vmem:[#allocation8 + $0x308] sm:$0xff] }
  0x99   :  { %2439 = vmatprep.subr.bf16.mxu0 %v3313_v15  ;;  %v946_v12 = vld [vmem:[#allocation8 + $0x328] sm:$0xff] }
  0x9a   :  { %3247 = vmatmul.mubr.msk.bf16.vlgmr.msra.gmra.mrb[4].mxu1 %vm625_vm2, %v3908_v28  ;;  %v3329_v28 = vcombine.high %v925_v33, %v929_v34  ;;  %v3347_v14 = vcombine.high %v942_v11, %v946_v12  ;;  %v3346_v15 = vcombine.low %v942_v11, %v946_v12  ;;  %v965_v33 = vld [vmem:[#allocation8 + $0x3c0] sm:$0xff] }
  0x9b   :  { %2510 = vmatpush1.bf16.msra.mxu1 %v3250_v16  ;;  %v949_v16 = vld [vmem:[#allocation8 + $0x340] sm:$0xff] }
  0x9c   :  { %2511 = vmatprep.subr.bf16.mxu1 %v3259_v18  ;;  %2440 = vmatpush1.bf16.msra.mxu0 %v3312_v19  ;;  %v953_v18 = vld [vmem:[#allocation8 + $0x360] sm:$0xff]  ;;  %v950_v19 = vld [vmem:[#allocation8 + $0x348] sm:$0xff] }
  0x9d   :  { %2441 = vmatprep.subr.bf16.mxu0 %v3321_v30  ;;  %v3353_v20 = vcombine.high %v949_v16, %v953_v18  ;;  %v3355_v23 = vcombine.high %v950_v19, %v954_v21  ;;  %v3360_v30 = vcombine.low %v957_v24, %v961_v25  ;;  %v969_v34 = vld [vmem:[#allocation8 + $0x3e0] sm:$0xff] }
  0x9e   :  { %v3368_v37 = vcombine.low %v965_v33, %v969_v34 }
  0x9f   :  { %2512 = vmatpush1.bf16.msra.mxu1 %v3258_v17  ;;  %v3352_v17 = vcombine.low %v949_v16, %v953_v18 }
  0xa0   :  { %2513 = vmatprep.subr.bf16.mxu1 %v3267_v22  ;;  %2442 = vmatpush1.bf16.msra.mxu0 %v3320_v29  ;;  %v3354_v22 = vcombine.low %v950_v19, %v954_v21  ;;  %v962_v29 = vld [vmem:[#allocation8 + $0x3a8] sm:$0xff] }
  0xa1   :  { %2443 = vmatprep.subr.bf16.mxu0 %v3329_v28  ;;  %v3363_v32 = vcombine.high %v958_v26, %v962_v29  ;;  %v3369_v28 = vcombine.high %v965_v33, %v969_v34 }
  0xa3   :  { %2514 = vmatpush1.bf16.msra.mxu1 %v3266_v27  ;;  %v3361_v27 = vcombine.high %v957_v24, %v961_v25 }
  0xa4   :  { %2515 = vmatprep.subr.bf16.mxu1 %v3275_v31  ;;  %2444 = vmatpush1.bf16.msra.mxu0 %v3328_v38  ;;  %v3362_v31 = vcombine.low %v958_v26, %v962_v29  ;;  %v3370_v38 = vcombine.low %v966_v35, %v970_v36 }
  0xa5   :  { %2445 = vmatprep.subr.bf16.mxu0 %v3337_v40  ;;  %v3923_v40 = vld [vmem:[#allocation8 + $0x400] sm:$0xff] }
  0xa7   :  { %2516 = vmatpush1.bf16.msra.mxu1 %v3274_v39  ;;  %v3371_v39 = vcombine.high %v966_v35, %v970_v36  ;;  %v985_v35 = vld [vmem:[#allocation8 + $0x460] sm:$0xff]  ;;  %v986_v36 = vld [vmem:[#allocation8 + $0x468] sm:$0xff] }
  0xa8   :  { %2517 = vmatprep.subr.bf16.mxu1 %v3283_v41  ;;  %2446 = vmatpush1.bf16.msra.mxu0 %v3336_v46  ;;  %v3925_v41 = vld [vmem:[#allocation8 + $0x420] sm:$0xff]  ;;  %v3378_v46 = vcombine.low %v3927_v42, %v3931_v44 }
  0xa9   :  { %2447 = vmatprep.subr.bf16.mxu0 %v3345_v48  ;;  %v3377_v43 = vcombine.high %v3923_v40, %v3925_v41  ;;  %v3376_v45 = vcombine.low %v3923_v40, %v3925_v41  ;;  %v178_v48 = vlaneseq }
  0xab   :  { %2518 = vmatpush1.bf16.msra.mxu1 %v3282_v47  ;;  %v3379_v47 = vcombine.high %v3927_v42, %v3931_v44  ;;  %v1005_v44 = vld [vmem:[#allocation8 + $0x500] sm:$0xff] }
  0xac   :  { %2519 = vmatprep.subr.bf16.mxu1 %v3291_v49  ;;  %2448 = vmatpush1.bf16.msra.mxu0 %v3344_v52  ;;  %v3939_v49 = vshrl.u32 %v178_v48, 7  ;;  %v3952_v52 = vld [vmem:[%s4089_s3] sm:$0xf] }
  0xad   :  { %2449 = vmatprep.subr.bf16.mxu0 %v3353_v20 }
  0xae   :  { %v3942_v50 = vsub.s32 2, %v3939_v49  ;;  %v4001_v40 = vsub.s32 3, %v3939_v49 }
  0xaf   :  { %2520 = vmatpush1.bf16.msra.mxu1 %v3290_v53 }
  0xb0   :  { %2521 = vmatprep.subr.bf16.mxu1 %v3299_v54  ;;  %2450 = vmatpush1.bf16.msra.mxu0 %v3352_v17  ;;  %v189_v53 = vrot.slane %v3947_v51, %v3942_v50  ;;  %v218_v54 = vrot.slane %v3952_v52, %v3942_v50 }
  0xb1   :  { %2451 = vmatprep.subr.bf16.mxu0 %v3361_v27 }
  0xb3   :  { %2522 = vmatpush1.bf16.msra.mxu1 %v3298_v57 }
  0xb4   :  { %2523 = vmatprep.subr.bf16.mxu1 %v3307_v58  ;;  %2452 = vmatpush1.bf16.msra.mxu0 %v3360_v30 }
  0xb5   :  { %2453 = vmatprep.subr.bf16.mxu0 %v3369_v28  ;;  %v982_v28 = vld [vmem:[#allocation8 + $0x448] sm:$0xff] }
  0xb6   :  { %v3387_v48 = vcombine.high %v982_v28, %v986_v36 }
  0xb7   :  { %2524 = vmatpush1.bf16.msra.mxu1 %v3306_v61 }
  0xb8   :  { %2525 = vmatprep.subr.bf16.mxu1 %v3315_v62  ;;  %2454 = vmatpush1.bf16.msra.mxu0 %v3368_v37 }
  0xb9   :  { %2466 = vmatprep.subr.bf16.mxu0 %v3377_v43 }
  0xbb   :  { %2526 = vmatpush1.bf16.msra.mxu1 %v3314_v2  ;;  %v3969_v2 = vsub.s32 0, %v3939_v49 }
  0xbc   :  { %2527 = vmatprep.subr.bf16.mxu1 %v3323_v3  ;;  %v3972_v3 = vsub.s32 1, %v3939_v49 }
  0xbd   :  { %v181_v4 = vrot.slane %v3947_v51, %v3969_v2 }
  0xbe   :  { %v185_v5 = vrot.slane %v3947_v51, %v3972_v3  ;;  %v214_v8 = vrot.slane %v3952_v52, %v3972_v3 }
  0xbf   :  { %2528 = vmatpush1.bf16.msra.mxu1 %v3322_v6 }
  0xc0   :  { %2529 = vmatprep.subr.bf16.mxu1 %v3331_v7  ;;  %v210_v7 = vrot.slane %v3952_v52, %v3969_v2 }
  0xc3   :  { %2530 = vmatpush1.bf16.msra.mxu1 %v3330_v9 }
  0xc4   :  { %2531 = vmatprep.subr.bf16.mxu1 %v3339_v10 }
  0xc7   :  { %2532 = vmatpush1.bf16.msra.mxu1 %v3338_v13 }
  0xc8   :  { %2533 = vmatprep.subr.bf16.mxu1 %v3347_v14 }
  0xcb   :  { %2534 = vmatpush1.bf16.msra.mxu1 %v3346_v15 }
  0xcc   :  { %2535 = vmatprep.subr.bf16.mxu1 %v3355_v23 }
  0xcf   :  { %2536 = vmatpush1.bf16.msra.mxu1 %v3354_v22 }
  0xd0   :  { %2537 = vmatprep.subr.bf16.mxu1 %v3363_v32  ;;  %v3958_v55 = vpop.permute.xlu0 %169  ;;  %v981_v32 = vld [vmem:[#allocation8 + $0x440] sm:$0xff] }
  0xd1   :  { %v200_v56 = vmul.f32 %v189_v53, %v3958_v55  ;;  %v198_v6 = vmul.f32 %v181_v4, %v3958_v55  ;;  %v199_v0 = vmul.f32 %v185_v5, %v3958_v55 }
  0xd3   :  { %2538 = vmatpush1.bf16.msra.mxu1 %v3362_v31  ;;  %v3961_v57 = vadd.f32 %v218_v54, %v200_v56  ;;  %v227_v10 = vadd.f32 %v210_v7, %v198_v6  ;;  %v228_v13 = vadd.f32 %v214_v8, %v199_v0  ;;  %v990_v56 = vld [vmem:[#allocation8 + $0x488] sm:$0xff] }
  0xd4   :  { %2539 = vmatprep.subr.bf16.mxu1 %v3371_v39  ;;  %v3963_v58 = vpop.permute.xlu0 %174  ;;  %v998_v6 = vld [vmem:[#allocation8 + $0x4c8] sm:$0xff] }
  0xd5   :  { %v204_v59 = vmul.f32 %v189_v53, %v3963_v58  ;;  %v202_v9 = vmul.f32 %v181_v4, %v3963_v58  ;;  %v203_v11 = vmul.f32 %v185_v5, %v3963_v58  ;;  %v989_v53 = vld [vmem:[#allocation8 + $0x480] sm:$0xff] }
  0xd6   :  { %v997_v4 = vld [vmem:[#allocation8 + $0x4c0] sm:$0xff] }
  0xd7   :  { %2540 = vmatpush1.bf16.msra.mxu1 %v3370_v38  ;;  %v3966_v60 = vadd.f32 %v218_v54, %v204_v59  ;;  %v231_v16 = vadd.f32 %v210_v7, %v202_v9  ;;  %v232_v20 = vadd.f32 %v214_v8, %v203_v11  ;;  %v993_v54 = vld [vmem:[#allocation8 + $0x4a0] sm:$0xff]  ;;  %v994_v59 = vld [vmem:[#allocation8 + $0x4a8] sm:$0xff] }
  0xd8   :  { %2552 = vmatprep.subr.bf16.mxu1 %v3379_v47  ;;  %v3385_v47 = vcombine.high %v981_v32, %v985_v35  ;;  %v1001_v5 = vld [vmem:[#allocation8 + $0x4e0] sm:$0xff]  ;;  %v1002_v7 = vld [vmem:[#allocation8 + $0x4e8] sm:$0xff]  ;;  %v3392_v0 = vcombine.low %v989_v53, %v993_v54  ;;  %v3394_v8 = vcombine.low %v990_v56, %v994_v59 }
  0xd9   :  { %v3401_v41 = vcombine.high %v997_v4, %v1001_v5  ;;  %v3403_v42 = vcombine.high %v998_v6, %v1002_v7  ;;  %v1010_v9 = vld [vmem:[#allocation8 + $0x528] sm:$0xff]  ;;  %v3402_v11 = vcombine.low %v998_v6, %v1002_v7 }
 0x11d   :  { %v722_v61 = vpop.f32.mrb[0].mxu1 }
 0x11e   :  { %v724_v62 = vpop.f32.mrb[1].mxu1 }
 0x11f   :  { %v726_v63 = vpop.f32.mrb[2].mxu1 }
 0x120   :  { %v728_v1 = vpop.f32.mrb[3].mxu1 }
 0x14d   :  { %v679_v12 = vpop.f32.mrb[0].mxu0 }
 0x14e   :  { %v680_v14 = vadd.f32 %v679_v12, %v227_v10  ;;  %v681_v15 = vpop.f32.mrb[1].mxu0  ;;  %v3400_v10 = vcombine.low %v997_v4, %v1001_v5  ;;  %v193_v12 = vrot.slane %v3947_v51, %v4001_v40  ;;  %v1037_v5 = vld [vmem:[#allocation8 + $0x600] sm:$0xff] }
 0x14f   :  { %v682_v18 = vadd.f32 %v681_v15, %v228_v13  ;;  %v683_v19 = vpop.f32.mrb[2].mxu0  ;;  %v1013_v15 = vld [vmem:[#allocation8 + $0x540] sm:$0xff] }
 0x150   :  { %v723_v21 = vadd.f32 %v722_v61, %v680_v14  ;;  %v684_v17 = vadd.f32 %v683_v19, %v231_v16  ;;  %v685_v22 = vpop.f32.mrb[3].mxu0  ;;  %v3384_v61 = vcombine.low %v981_v32, %v985_v35  ;;  %v1017_v16 = vld [vmem:[#allocation8 + $0x560] sm:$0xff]  ;;  %v1018_v19 = vld [vmem:[#allocation8 + $0x568] sm:$0xff] }
 0x151   :  { %v725_v23 = vadd.f32 %v724_v62, %v682_v18  ;;  %v686_v24 = vadd.f32 %v685_v22, %v232_v20  ;;  %v3386_v62 = vcombine.low %v982_v28, %v986_v36  ;;  %v1014_v18 = vld [vmem:[#allocation8 + $0x548] sm:$0xff]  ;;  %v201_v22 = vmul.f32 %v193_v12, %v3958_v55  ;;  %v1029_v35 = vld [vmem:[#allocation8 + $0x5c0] sm:$0xff] }
 0x152   :  { %v825_v25 = vmul.f32 0.2, %v723_v21  ;;  %v727_v26 = vadd.f32 %v726_v63, %v684_v17  ;;  %vm817_vm3 = vcmp.gt.f32.partialorder %v723_v21, 0.0  ;;  %v3393_v63 = vcombine.high %v989_v53, %v993_v54  ;;  %v1033_v55 = vld [vmem:[#allocation8 + $0x5e0] sm:$0xff] }
 0x153   :  { %v826_v27 = vmul.f32 0.2, %v725_v23  ;;  %v729_v29 = vadd.f32 %v728_v1, %v686_v24  ;;  %vm818_vm4 = vcmp.gt.f32.partialorder %v725_v23, 0.0  ;;  %v3395_v1 = vcombine.high %v990_v56, %v994_v59  ;;  %v1021_v24 = vld [vmem:[#allocation8 + $0x580] sm:$0xff] }
 0x154   :  { %vm821_vm5 = vcmp.gt.f32.partialorder %v727_v26, 0.0  ;;  %v829_v30 = vmul.f32 0.2, %v727_v26  ;;  %v833_v33 = vsel %vm817_vm3, %v723_v21, %v825_v25  ;;  %v222_v17 = vrot.slane %v3952_v52, %v4001_v40  ;;  %v1025_v25 = vld [vmem:[#allocation8 + $0x5a0] sm:$0xff] }
 0x155   :  { %vm822_vm6 = vcmp.gt.f32.partialorder %v729_v29, 0.0  ;;  %v830_v31 = vmul.f32 0.2, %v729_v29  ;;  %v834_v37 = vsel %vm818_vm4, %v725_v23, %v826_v27  ;;  %v3417_v51 = vcombine.high %v1013_v15, %v1017_v16  ;;  %v1026_v27 = vld [vmem:[#allocation8 + $0x5a8] sm:$0xff] }
 0x156   :  { %v837_v34 = vsel %vm821_vm5, %v727_v26, %v829_v30  ;;  %v3419_v23 = vcombine.high %v1014_v18, %v1018_v19  ;;  %v1022_v26 = vld [vmem:[#allocation8 + $0x588] sm:$0xff]  ;;  %v3416_v30 = vcombine.low %v1013_v15, %v1017_v16  ;;  %v3425_v52 = vcombine.high %v1021_v24, %v1025_v25 }
 0x157   :  { %v838_v38 = vsel %vm822_vm6, %v729_v29, %v830_v31  ;;  %v3986_v39 = vpack.c.bf16 %v837_v34, %v833_v33  ;;  %v205_v29 = vmul.f32 %v193_v12, %v3963_v58  ;;  %v3418_v31 = vcombine.low %v1014_v18, %v1018_v19  ;;  %v1046_v15 = vld [vmem:[#allocation8 + $0x648] sm:$0xff] }
 0x158   :  { %v3988_v43 = vpack.c.bf16 %v838_v38, %v834_v37  ;;  %v230_v33 = vadd.f32 %v222_v17, %v201_v22  ;;  %v3427_v34 = vcombine.high %v1022_v26, %v1026_v27  ;;  %v1030_v37 = vld [vmem:[#allocation8 + $0x5c8] sm:$0xff]  ;;  %v3424_v53 = vcombine.low %v1021_v24, %v1025_v25  ;;  %v1057_v22 = vld [vmem:[#allocation8 + $0x6a0] sm:$0xff] }
 0x159   :  { %v1034_v38 = vld [vmem:[#allocation8 + $0x5e8] sm:$0xff]  ;;  %v234_v58 = vadd.f32 %v222_v17, %v205_v29  ;;  %v3432_v7 = vcombine.low %v1029_v35, %v1033_v55  ;;  %v1053_v17 = vld [vmem:[#allocation8 + $0x680] sm:$0xff] }
 0x15a   :  { %2455 = vmatprep.mubr.bf16.mxu0 %v3988_v43  ;;  %2541 = vmatprep.mubr.bf16.mxu1 %v3988_v43  ;;  %v1050_v16 = vld [vmem:[#allocation8 + $0x668] sm:$0xff]  ;;  %v1061_v29 = vld [vmem:[#allocation8 + $0x6c0] sm:$0xff] }
 0x15b   :  { %2456 = vmatmul.mubr.bf16.vlgmr.msra.gmra.mrb[4].mxu0 %v3986_v39  ;;  %2542 = vmatmul.mubr.bf16.vlgmr.msra.gmra.mrb[8].mxu1 %v3986_v39  ;;  %v3450_v25 = vcombine.low %v1046_v15, %v1050_v16 }
 0x15c   :  { %2467 = vmatpush1.bf16.msra.mxu0 %v3376_v45  ;;  %2553 = vmatpush1.bf16.msra.mxu1 %v3378_v46  ;;  %v1009_v45 = vld [vmem:[#allocation8 + $0x520] sm:$0xff]  ;;  %v1006_v46 = vld [vmem:[#allocation8 + $0x508] sm:$0xff] }
 0x15d   :  { %2468 = vmatprep.subr.bf16.mxu0 %v3385_v47  ;;  %2554 = vmatprep.subr.bf16.mxu1 %v3387_v48  ;;  %v3409_v13 = vcombine.high %v1005_v44, %v1009_v45  ;;  %v3411_v14 = vcombine.high %v1006_v46, %v1010_v9  ;;  %v3408_v20 = vcombine.low %v1005_v44, %v1009_v45 }
 0x15e   :  { %v3410_v21 = vcombine.low %v1006_v46, %v1010_v9  ;;  %v3434_v44 = vcombine.low %v1030_v37, %v1034_v38 }
 0x160   :  { %2469 = vmatpush1.bf16.msra.mxu0 %v3384_v61  ;;  %2555 = vmatpush1.bf16.msra.mxu1 %v3386_v62  ;;  %v3426_v61 = vcombine.low %v1022_v26, %v1026_v27  ;;  %v3433_v62 = vcombine.high %v1029_v35, %v1033_v55  ;;  %v3457_v26 = vcombine.high %v1053_v17, %v1057_v22  ;;  %v1069_v55 = vld [vmem:[#allocation8 + $0x700] sm:$0xff] }
 0x161   :  { %2470 = vmatprep.subr.bf16.mxu0 %v3393_v63  ;;  %2556 = vmatprep.subr.bf16.mxu1 %v3395_v1 }
 0x164   :  { %2471 = vmatpush1.bf16.msra.mxu0 %v3392_v0  ;;  %2557 = vmatpush1.bf16.msra.mxu1 %v3394_v8  ;;  %v1041_v0 = vld [vmem:[#allocation8 + $0x620] sm:$0xff]  ;;  %v1042_v8 = vld [vmem:[#allocation8 + $0x628] sm:$0xff] }
 0x165   :  { %2472 = vmatprep.subr.bf16.mxu0 %v3401_v41  ;;  %2558 = vmatprep.subr.bf16.mxu1 %v3403_v42  ;;  %v3441_v12 = vcombine.high %v1037_v5, %v1041_v0  ;;  %v3440_v18 = vcombine.low %v1037_v5, %v1041_v0  ;;  %v1086_v5 = vld [vmem:[#allocation8 + $0x788] sm:$0xff] }
 0x168   :  { %2473 = vmatpush1.bf16.msra.mxu0 %v3400_v10  ;;  %2559 = vmatpush1.bf16.msra.mxu1 %v3402_v11  ;;  %v1045_v10 = vld [vmem:[#allocation8 + $0x640] sm:$0xff] }
 0x169   :  { %2474 = vmatprep.subr.bf16.mxu0 %v3409_v13  ;;  %2560 = vmatprep.subr.bf16.mxu1 %v3411_v14  ;;  %v1049_v14 = vld [vmem:[#allocation8 + $0x660] sm:$0xff] }
 0x16a   :  { %v3448_v24 = vcombine.low %v1045_v10, %v1049_v14 }
 0x16c   :  { %2475 = vmatpush1.bf16.msra.mxu0 %v3408_v20  ;;  %2561 = vmatpush1.bf16.msra.mxu1 %v3410_v21  ;;  %v3449_v20 = vcombine.high %v1045_v10, %v1049_v14  ;;  %v3451_v21 = vcombine.high %v1046_v15, %v1050_v16  ;;  %v847_v14 = vld [vmem:[#allocation8 + $0x10] sm:$0xff]  ;;  %v848_v16 = vld [vmem:[#allocation8 + $0x18] sm:$0xff] }
 0x16d   :  { %v808_v32 = vpop.f32.mrb[4].mxu1  ;;  %2476 = vmatprep.subr.bf16.mxu0 %v3417_v51  ;;  %2562 = vmatprep.subr.bf16.mxu1 %v3419_v23  ;;  %v1054_v51 = vld [vmem:[#allocation8 + $0x688] sm:$0xff]  ;;  %v851_v15 = vld [vmem:[#allocation8 + $0x30] sm:$0xff] }
 0x16e   :  { %v3528_v28 = vadd.f32 %v808_v32, %v3961_v57  ;;  %v810_v36 = vpop.f32.mrb[5].mxu1  ;;  %v3435_v57 = vcombine.high %v1030_v37, %v1034_v38  ;;  %v1058_v23 = vld [vmem:[#allocation8 + $0x6a8] sm:$0xff] }
 0x16f   :  { %v3529_v47 = vadd.f32 %v810_v36, %v230_v33  ;;  %v812_v48 = vpop.f32.mrb[6].mxu1  ;;  %v3459_v27 = vcombine.high %v1054_v51, %v1058_v23  ;;  %v1066_v32 = vld [vmem:[#allocation8 + $0x6e8] sm:$0xff]  ;;  %v3456_v33 = vcombine.low %v1053_v17, %v1057_v22  ;;  %v855_v22 = vld [vmem:[#allocation8 + $0x50] sm:$0xff] }
 0x170   :  { %v827_v54 = vmul.f32 0.2, %v3528_v28  ;;  %v3530_v56 = vadd.f32 %v812_v48, %v3966_v60  ;;  %2477 = vmatpush1.bf16.msra.mxu0 %v3416_v30  ;;  %2563 = vmatpush1.bf16.msra.mxu1 %v3418_v31  ;;  %v814_v59 = vpop.f32.mrb[7].mxu1  ;;  %vm819_vm7 = vcmp.gt.f32.partialorder %v3528_v28, 0.0  ;;  %v1038_v60 = vld [vmem:[#allocation8 + $0x608] sm:$0xff]  ;;  %v1065_v30 = vld [vmem:[#allocation8 + $0x6e0] sm:$0xff] }
 0x171   :  { %v828_v63 = vmul.f32 0.2, %v3529_v47  ;;  %v3531_v1 = vadd.f32 %v814_v59, %v234_v58  ;;  %2478 = vmatprep.subr.bf16.mxu0 %v3425_v52  ;;  %2564 = vmatprep.subr.bf16.mxu1 %v3427_v34  ;;  %vm820_vm8 = vcmp.gt.f32.partialorder %v3529_v47, 0.0  ;;  %v3443_v13 = vcombine.high %v1038_v60, %v1042_v8  ;;  %v1062_v31 = vld [vmem:[#allocation8 + $0x6c8] sm:$0xff] }
 0x172   :  { %vm823_vm9 = vcmp.gt.f32.partialorder %v3530_v56, 0.0  ;;  %v831_v4 = vmul.f32 0.2, %v3530_v56  ;;  %v835_v41 = vsel %vm819_vm7, %v3528_v28, %v827_v54  ;;  %v3442_v19 = vcombine.low %v1038_v60, %v1042_v8  ;;  %v1073_v28 = vld [vmem:[#allocation8 + $0x720] sm:$0xff]  ;;  %v1070_v36 = vld [vmem:[#allocation8 + $0x708] sm:$0xff] }
 0x173   :  { %vm824_vm10 = vcmp.gt.f32.partialorder %v3531_v1, 0.0  ;;  %v832_v6 = vmul.f32 0.2, %v3531_v1  ;;  %v836_v45 = vsel %vm820_vm8, %v3529_v47, %v828_v63  ;;  %v3458_v52 = vcombine.low %v1054_v51, %v1058_v23  ;;  %v1074_v37 = vld [vmem:[#allocation8 + $0x728] sm:$0xff]  ;;  %v1081_v54 = vld [vmem:[#allocation8 + $0x760] sm:$0xff]  ;;  %v859_v51 = vld [vmem:[#allocation8 + $0x70] sm:$0xff] }
 0x174   :  { %v839_v42 = vsel %vm823_vm9, %v3530_v56, %v831_v4  ;;  %2479 = vmatpush1.bf16.msra.mxu0 %v3424_v53  ;;  %2565 = vmatpush1.bf16.msra.mxu1 %v3426_v61  ;;  %v3465_v34 = vcombine.high %v1061_v29, %v1065_v30  ;;  %v3467_v35 = vcombine.high %v1062_v31, %v1066_v32  ;;  %v1077_v53 = vld [vmem:[#allocation8 + $0x740] sm:$0xff]  ;;  %v1078_v56 = vld [vmem:[#allocation8 + $0x748] sm:$0xff]  ;;  %v856_v23 = vld [vmem:[#allocation8 + $0x58] sm:$0xff] }
 0x175   :  { %v4012_v46 = vpack.c.bf16 %v839_v42, %v835_v41  ;;  %v840_v9 = vsel %vm824_vm10, %v3531_v1, %v832_v6  ;;  %2480 = vmatprep.subr.bf16.mxu0 %v3433_v62  ;;  %2566 = vmatprep.subr.bf16.mxu1 %v3435_v57  ;;  %v3464_v38 = vcombine.low %v1061_v29, %v1065_v30  ;;  %v1082_v59 = vld [vmem:[#allocation8 + $0x768] sm:$0xff]  ;;  %v1085_v57 = vld [vmem:[#allocation8 + $0x780] sm:$0xff]  ;;  %v863_v30 = vld [vmem:[#allocation8 + $0x90] sm:$0xff] }
 0x176   :  { %v4014_v11 = vpack.c.bf16 %v840_v9, %v836_v45  ;;  %v3466_v47 = vcombine.low %v1062_v31, %v1066_v32  ;;  %v3473_v48 = vcombine.high %v1069_v55, %v1073_v28  ;;  %v3475_v58 = vcombine.high %v1070_v36, %v1074_v37  ;;  %v1089_v4 = vld [vmem:[#allocation8 + $0x7a0] sm:$0xff]  ;;  %v1090_v6 = vld [vmem:[#allocation8 + $0x7a8] sm:$0xff]  ;;  %v867_v31 = vld [vmem:[#allocation8 + $0xb0] sm:$0xff] }
 0x177   :  { %v3472_v61 = vcombine.low %v1069_v55, %v1073_v28  ;;  %v3474_v62 = vcombine.low %v1070_v36, %v1074_v37  ;;  %v3481_v63 = vcombine.high %v1077_v53, %v1081_v54  ;;  %v3483_v1 = vcombine.high %v1078_v56, %v1082_v59  ;;  %v1093_v41 = vld [vmem:[#allocation8 + $0x7c0] sm:$0xff]  ;;  %v1098_v45 = vld [vmem:[#allocation8 + $0x7e8] sm:$0xff]  ;;  %v864_v32 = vld [vmem:[#allocation8 + $0x98] sm:$0xff] }
 0x178   :  { %2481 = vmatpush1.bf16.msra.mxu0 %v3432_v7  ;;  %2567 = vmatpush1.bf16.msra.mxu1 %v3434_v44  ;;  %v3480_v7 = vcombine.low %v1077_v53, %v1081_v54  ;;  %v3482_v0 = vcombine.low %v1078_v56, %v1082_v59  ;;  %v3489_v60 = vcombine.high %v1085_v57, %v1089_v4  ;;  %v1097_v42 = vld [vmem:[#allocation8 + $0x7e0] sm:$0xff]  ;;  %v1094_v44 = vld [vmem:[#allocation8 + $0x7c8] sm:$0xff]  ;;  %v871_v28 = vld [vmem:[#allocation8 + $0xd0] sm:$0xff] }
 0x179   :  { %2498 = vmatprep.mubr.bf16.mxu0 %v4014_v11  ;;  %2584 = vmatprep.mubr.bf16.mxu1 %v4014_v11  ;;  %v3491_v8 = vcombine.high %v1086_v5, %v1090_v6  ;;  %v3488_v9 = vcombine.low %v1085_v57, %v1089_v4  ;;  %v3490_v10 = vcombine.low %v1086_v5, %v1090_v6  ;;  %v875_v36 = vld [vmem:[#allocation8 + $0xf0] sm:$0xff]  ;;  %v872_v37 = vld [vmem:[#allocation8 + $0xd8] sm:$0xff] }
 0x17a   :  { %2482 = vmatprep.subr.bf16.mxu0 %v3441_v12  ;;  %2568 = vmatprep.subr.bf16.mxu1 %v3443_v13  ;;  %v3497_v12 = vcombine.high %v1093_v41, %v1097_v42  ;;  %v3499_v13 = vcombine.high %v1094_v44, %v1098_v45  ;;  %v879_v54 = vld [vmem:[#allocation8 + $0x110] sm:$0xff]  ;;  %v884_v59 = vld [vmem:[#allocation8 + $0x138] sm:$0xff] }
 0x17b   :  { %v883_v56 = vld [vmem:[#allocation8 + $0x130] sm:$0xff]  ;;  %v888_v5 = vld [vmem:[#allocation8 + $0x158] sm:$0xff] }
 0x17c   :  { %2483 = vmatpush1.bf16.msra.mxu0 %v3440_v18  ;;  %2569 = vmatpush1.bf16.msra.mxu1 %v3442_v19  ;;  %v852_v18 = vld [vmem:[#allocation8 + $0x38] sm:$0xff]  ;;  %v3496_v19 = vcombine.low %v1093_v41, %v1097_v42  ;;  %v887_v57 = vld [vmem:[#allocation8 + $0x150] sm:$0xff] }
 0x17d   :  { %2484 = vmatprep.subr.bf16.mxu0 %v3449_v20  ;;  %2570 = vmatprep.subr.bf16.mxu1 %v3451_v21  ;;  %v3498_v20 = vcombine.low %v1094_v44, %v1098_v45  ;;  %v3253_v21 = vcombine.high %v847_v14, %v851_v15  ;;  %v3255_v17 = vcombine.high %v848_v16, %v852_v18  ;;  %v891_v4 = vld [vmem:[#allocation8 + $0x170] sm:$0xff]  ;;  %v892_v6 = vld [vmem:[#allocation8 + $0x178] sm:$0xff] }
 0x17e   :  { %v895_v41 = vld [vmem:[#allocation8 + $0x190] sm:$0xff]  ;;  %v896_v44 = vld [vmem:[#allocation8 + $0x198] sm:$0xff] }
 0x17f   :  { %v899_v42 = vld [vmem:[#allocation8 + $0x1b0] sm:$0xff]  ;;  %v900_v45 = vld [vmem:[#allocation8 + $0x1b8] sm:$0xff] }
 0x180   :  { %2485 = vmatpush1.bf16.msra.mxu0 %v3448_v24  ;;  %2571 = vmatpush1.bf16.msra.mxu1 %v3450_v25  ;;  %v860_v24 = vld [vmem:[#allocation8 + $0x78] sm:$0xff]  ;;  %v3252_v25 = vcombine.low %v847_v14, %v851_v15  ;;  %v903_v14 = vld [vmem:[#allocation8 + $0x1d0] sm:$0xff] }
 0x181   :  { %2486 = vmatprep.subr.bf16.mxu0 %v3457_v26  ;;  %2572 = vmatprep.subr.bf16.mxu1 %v3459_v27  ;;  %v3254_v26 = vcombine.low %v848_v16, %v852_v18  ;;  %v3261_v27 = vcombine.high %v855_v22, %v859_v51  ;;  %v3263_v29 = vcombine.high %v856_v23, %v860_v24  ;;  %v907_v15 = vld [vmem:[#allocation8 + $0x1f0] sm:$0xff]  ;;  %v904_v16 = vld [vmem:[#allocation8 + $0x1d8] sm:$0xff] }
 0x182   :  { %v908_v18 = vld [vmem:[#allocation8 + $0x1f8] sm:$0xff] }
 0x184   :  { %2487 = vmatpush1.bf16.msra.mxu0 %v3456_v33  ;;  %2573 = vmatpush1.bf16.msra.mxu1 %v3458_v52  ;;  %v868_v33 = vld [vmem:[#allocation8 + $0xb8] sm:$0xff]  ;;  %v3260_v52 = vcombine.low %v855_v22, %v859_v51  ;;  %v911_v22 = vld [vmem:[#allocation8 + $0x210] sm:$0xff] }
 0x185   :  { %2488 = vmatprep.subr.bf16.mxu0 %v3465_v34  ;;  %2574 = vmatprep.subr.bf16.mxu1 %v3467_v35  ;;  %v3262_v34 = vcombine.low %v856_v23, %v860_v24  ;;  %v3269_v35 = vcombine.high %v863_v30, %v867_v31  ;;  %v3271_v55 = vcombine.high %v864_v32, %v868_v33  ;;  %v915_v51 = vld [vmem:[#allocation8 + $0x230] sm:$0xff]  ;;  %v912_v23 = vld [vmem:[#allocation8 + $0x218] sm:$0xff] }
 0x186   :  { %v916_v24 = vld [vmem:[#allocation8 + $0x238] sm:$0xff] }
 0x188   :  { %2489 = vmatpush1.bf16.msra.mxu0 %v3464_v38  ;;  %2575 = vmatpush1.bf16.msra.mxu1 %v3466_v47  ;;  %v876_v38 = vld [vmem:[#allocation8 + $0xf8] sm:$0xff]  ;;  %v3268_v47 = vcombine.low %v863_v30, %v867_v31  ;;  %v919_v30 = vld [vmem:[#allocation8 + $0x250] sm:$0xff] }
 0x189   :  { %2490 = vmatprep.subr.bf16.mxu0 %v3473_v48  ;;  %2576 = vmatprep.subr.bf16.mxu1 %v3475_v58  ;;  %v3270_v48 = vcombine.low %v864_v32, %v868_v33  ;;  %v3277_v58 = vcombine.high %v871_v28, %v875_v36  ;;  %v3279_v53 = vcombine.high %v872_v37, %v876_v38  ;;  %v923_v31 = vld [vmem:[#allocation8 + $0x270] sm:$0xff]  ;;  %v920_v32 = vld [vmem:[#allocation8 + $0x258] sm:$0xff] }
 0x18a   :  { %v924_v33 = vld [vmem:[#allocation8 + $0x278] sm:$0xff] }
 0x18c   :  { %2491 = vmatpush1.bf16.msra.mxu0 %v3472_v61  ;;  %2577 = vmatpush1.bf16.msra.mxu1 %v3474_v62  ;;  %v3276_v61 = vcombine.low %v871_v28, %v875_v36  ;;  %v3278_v62 = vcombine.low %v872_v37, %v876_v38  ;;  %v927_v28 = vld [vmem:[#allocation8 + $0x290] sm:$0xff]  ;;  %v928_v37 = vld [vmem:[#allocation8 + $0x298] sm:$0xff] }
 0x18d   :  { %2492 = vmatprep.subr.bf16.mxu0 %v3481_v63  ;;  %2578 = vmatprep.subr.bf16.mxu1 %v3483_v1  ;;  %v3285_v63 = vcombine.high %v879_v54, %v883_v56  ;;  %v931_v36 = vld [vmem:[#allocation8 + $0x2b0] sm:$0xff]  ;;  %v932_v38 = vld [vmem:[#allocation8 + $0x2b8] sm:$0xff] }
 0x190   :  { %2493 = vmatpush1.bf16.msra.mxu0 %v3480_v7  ;;  %2579 = vmatpush1.bf16.msra.mxu1 %v3482_v0  ;;  %v3284_v7 = vcombine.low %v879_v54, %v883_v56  ;;  %v935_v54 = vld [vmem:[#allocation8 + $0x2d0] sm:$0xff] }
 0x191   :  { %2494 = vmatprep.subr.bf16.mxu0 %v3489_v60  ;;  %2580 = vmatprep.subr.bf16.mxu1 %v3491_v8  ;;  %v3293_v60 = vcombine.high %v887_v57, %v891_v4  ;;  %v3295_v8 = vcombine.high %v888_v5, %v892_v6  ;;  %v939_v56 = vld [vmem:[#allocation8 + $0x2f0] sm:$0xff] }
 0x194   :  { %2495 = vmatpush1.bf16.msra.mxu0 %v3488_v9  ;;  %2581 = vmatpush1.bf16.msra.mxu1 %v3490_v10  ;;  %v3292_v9 = vcombine.low %v887_v57, %v891_v4  ;;  %v3294_v10 = vcombine.low %v888_v5, %v892_v6  ;;  %v943_v57 = vld [vmem:[#allocation8 + $0x310] sm:$0xff]  ;;  %v944_v5 = vld [vmem:[#allocation8 + $0x318] sm:$0xff] }
 0x195   :  { %2496 = vmatprep.subr.bf16.mxu0 %v3497_v12  ;;  %2582 = vmatprep.subr.bf16.mxu1 %v3499_v13  ;;  %v3301_v12 = vcombine.high %v895_v41, %v899_v42  ;;  %v3303_v13 = vcombine.high %v896_v44, %v900_v45  ;;  %v947_v4 = vld [vmem:[#allocation8 + $0x330] sm:$0xff]  ;;  %v948_v6 = vld [vmem:[#allocation8 + $0x338] sm:$0xff] }
 0x198   :  { %2497 = vmatpush1.bf16.msra.mxu0 %v3496_v19  ;;  %2583 = vmatpush1.bf16.msra.mxu1 %v3498_v20  ;;  %v3300_v19 = vcombine.low %v895_v41, %v899_v42  ;;  %v3302_v20 = vcombine.low %v896_v44, %v900_v45  ;;  %v951_v41 = vld [vmem:[#allocation8 + $0x350] sm:$0xff]  ;;  %v952_v44 = vld [vmem:[#allocation8 + $0x358] sm:$0xff] }
 0x199   :  { %2595 = vmatprep.subr.bf16.mxu0 %v3253_v21  ;;  %2681 = vmatprep.subr.bf16.mxu1 %v3255_v17  ;;  %v3309_v21 = vcombine.high %v903_v14, %v907_v15  ;;  %v3311_v17 = vcombine.high %v904_v16, %v908_v18  ;;  %v955_v42 = vld [vmem:[#allocation8 + $0x370] sm:$0xff]  ;;  %v956_v45 = vld [vmem:[#allocation8 + $0x378] sm:$0xff] }
 0x19b   :  { %2499 = vmatmul.mubr.bf16.vlgmr.msra.gmra.mrb[4].mxu0 %v4012_v46  ;;  %2585 = vmatmul.mubr.bf16.vlgmr.msra.gmra.mrb[8].mxu1 %v4012_v46 }
 0x19c   :  { %2596 = vmatpush1.bf16.msra.mxu0 %v3252_v25  ;;  %2627 = vmatprep.mubr.bf16.mxu0 %v3988_v43  ;;  %v3308_v25 = vcombine.low %v903_v14, %v907_v15  ;;  %v959_v14 = vld [vmem:[#allocation8 + $0x390] sm:$0xff] }
 0x19d   :  { %2682 = vmatpush1.bf16.msra.mxu1 %v3254_v26  ;;  %2713 = vmatprep.mubr.bf16.mxu1 %v3988_v43  ;;  %v880_v43 = vld [vmem:[#allocation8 + $0x118] sm:$0xff]  ;;  %v3310_v26 = vcombine.low %v904_v16, %v908_v18  ;;  %v963_v15 = vld [vmem:[#allocation8 + $0x3b0] sm:$0xff] }
 0x19e   :  { %2597 = vmatprep.subr.bf16.mxu0 %v3261_v27  ;;  %2683 = vmatprep.subr.bf16.mxu1 %v3263_v29  ;;  %v3287_v1 = vcombine.high %v880_v43, %v884_v59  ;;  %v3286_v0 = vcombine.low %v880_v43, %v884_v59  ;;  %v3317_v27 = vcombine.high %v911_v22, %v915_v51  ;;  %v936_v43 = vld [vmem:[#allocation8 + $0x2d8] sm:$0xff] }
 0x19f   :  { %v3319_v29 = vcombine.high %v912_v23, %v916_v24  ;;  %v940_v59 = vld [vmem:[#allocation8 + $0x2f8] sm:$0xff] }
 0x1a0   :  { %2598 = vmatpush1.bf16.msra.mxu0 %v3260_v52  ;;  %v3316_v52 = vcombine.low %v911_v22, %v915_v51  ;;  %v960_v16 = vld [vmem:[#allocation8 + $0x398] sm:$0xff]  ;;  %v967_v22 = vld [vmem:[#allocation8 + $0x3d0] sm:$0xff] }
 0x1a1   :  { %2684 = vmatpush1.bf16.msra.mxu1 %v3262_v34  ;;  %2599 = vmatprep.subr.bf16.mxu0 %v3269_v35  ;;  %v3318_v34 = vcombine.low %v912_v23, %v916_v24  ;;  %v3325_v35 = vcombine.high %v919_v30, %v923_v31  ;;  %v964_v18 = vld [vmem:[#allocation8 + $0x3b8] sm:$0xff]  ;;  %v971_v51 = vld [vmem:[#allocation8 + $0x3f0] sm:$0xff] }
 0x1a2   :  { %2685 = vmatprep.subr.bf16.mxu1 %v3271_v55  ;;  %v3327_v55 = vcombine.high %v920_v32, %v924_v33  ;;  %v968_v23 = vld [vmem:[#allocation8 + $0x3d8] sm:$0xff] }
 0x1a3   :  { %v972_v24 = vld [vmem:[#allocation8 + $0x3f8] sm:$0xff] }
 0x1a4   :  { %2600 = vmatpush1.bf16.msra.mxu0 %v3268_v47  ;;  %v3324_v47 = vcombine.low %v919_v30, %v923_v31  ;;  %v975_v30 = vld [vmem:[#allocation8 + $0x410] sm:$0xff] }
 0x1a5   :  { %2686 = vmatpush1.bf16.msra.mxu1 %v3270_v48  ;;  %2601 = vmatprep.subr.bf16.mxu0 %v3277_v58  ;;  %v3326_v48 = vcombine.low %v920_v32, %v924_v33  ;;  %v3333_v58 = vcombine.high %v927_v28, %v931_v36  ;;  %v979_v31 = vld [vmem:[#allocation8 + $0x430] sm:$0xff]  ;;  %v976_v32 = vld [vmem:[#allocation8 + $0x418] sm:$0xff] }
 0x1a6   :  { %2687 = vmatprep.subr.bf16.mxu1 %v3279_v53  ;;  %v3335_v53 = vcombine.high %v928_v37, %v932_v38  ;;  %v980_v33 = vld [vmem:[#allocation8 + $0x438] sm:$0xff] }
 0x1a8   :  { %2602 = vmatpush1.bf16.msra.mxu0 %v3276_v61  ;;  %v3332_v61 = vcombine.low %v927_v28, %v931_v36  ;;  %v983_v28 = vld [vmem:[#allocation8 + $0x450] sm:$0xff] }
 0x1a9   :  { %2688 = vmatpush1.bf16.msra.mxu1 %v3278_v62  ;;  %2603 = vmatprep.subr.bf16.mxu0 %v3285_v63  ;;  %v3334_v62 = vcombine.low %v928_v37, %v932_v38  ;;  %v3341_v63 = vcombine.high %v935_v54, %v939_v56  ;;  %v987_v36 = vld [vmem:[#allocation8 + $0x470] sm:$0xff]  ;;  %v3380_v37 = vcombine.low %v975_v30, %v979_v31  ;;  %v984_v38 = vld [vmem:[#allocation8 + $0x458] sm:$0xff] }
 0x1aa   :  { %2689 = vmatprep.subr.bf16.mxu1 %v3287_v1  ;;  %v3343_v1 = vcombine.high %v936_v43, %v940_v59 }
 0x1ac   :  { %2604 = vmatpush1.bf16.msra.mxu0 %v3284_v7  ;;  %v3340_v7 = vcombine.low %v935_v54, %v939_v56  ;;  %v995_v54 = vld [vmem:[#allocation8 + $0x4b0] sm:$0xff] }
 0x1ad   :  { %2690 = vmatpush1.bf16.msra.mxu1 %v3286_v0  ;;  %2605 = vmatprep.subr.bf16.mxu0 %v3293_v60  ;;  %v3342_v0 = vcombine.low %v936_v43, %v940_v59  ;;  %v3349_v60 = vcombine.high %v943_v57, %v947_v4  ;;  %v992_v43 = vld [vmem:[#allocation8 + $0x498] sm:$0xff] }
 0x1ae   :  { %2691 = vmatprep.subr.bf16.mxu1 %v3295_v8  ;;  %v3351_v8 = vcombine.high %v944_v5, %v948_v6  ;;  %v996_v59 = vld [vmem:[#allocation8 + $0x4b8] sm:$0xff] }
 0x1b0   :  { %2606 = vmatpush1.bf16.msra.mxu0 %v3292_v9  ;;  %v3348_v9 = vcombine.low %v943_v57, %v947_v4  ;;  %v999_v57 = vld [vmem:[#allocation8 + $0x4d0] sm:$0xff] }
 0x1b1   :  { %2692 = vmatpush1.bf16.msra.mxu1 %v3294_v10  ;;  %2607 = vmatprep.subr.bf16.mxu0 %v3301_v12  ;;  %v3350_v10 = vcombine.low %v944_v5, %v948_v6  ;;  %v3357_v12 = vcombine.high %v951_v41, %v955_v42  ;;  %v1003_v4 = vld [vmem:[#allocation8 + $0x4f0] sm:$0xff]  ;;  %v1000_v5 = vld [vmem:[#allocation8 + $0x4d8] sm:$0xff] }
 0x1b2   :  { %2693 = vmatprep.subr.bf16.mxu1 %v3303_v13  ;;  %v3359_v13 = vcombine.high %v952_v44, %v956_v45  ;;  %v1004_v6 = vld [vmem:[#allocation8 + $0x4f8] sm:$0xff] }
 0x1b4   :  { %2608 = vmatpush1.bf16.msra.mxu0 %v3300_v19  ;;  %v3356_v19 = vcombine.low %v951_v41, %v955_v42  ;;  %v1011_v41 = vld [vmem:[#allocation8 + $0x530] sm:$0xff]  ;;  %v1008_v42 = vld [vmem:[#allocation8 + $0x518] sm:$0xff] }
 0x1b5   :  { %2694 = vmatpush1.bf16.msra.mxu1 %v3302_v20  ;;  %2609 = vmatprep.subr.bf16.mxu0 %v3309_v21  ;;  %v3358_v20 = vcombine.low %v952_v44, %v956_v45  ;;  %v3365_v21 = vcombine.high %v959_v14, %v963_v15  ;;  %v1012_v44 = vld [vmem:[#allocation8 + $0x538] sm:$0xff]  ;;  %v3406_v45 = vcombine.low %v1000_v5, %v1004_v6 }
 0x1b6   :  { %2695 = vmatprep.subr.bf16.mxu1 %v3311_v17  ;;  %v3367_v17 = vcombine.high %v960_v16, %v964_v18 }
 0x1b8   :  { %2610 = vmatpush1.bf16.msra.mxu0 %v3308_v25  ;;  %v3364_v25 = vcombine.low %v959_v14, %v963_v15  ;;  %v1016_v14 = vld [vmem:[#allocation8 + $0x558] sm:$0xff] }
 0x1b9   :  { %2696 = vmatpush1.bf16.msra.mxu1 %v3310_v26  ;;  %2611 = vmatprep.subr.bf16.mxu0 %v3317_v27  ;;  %v3366_v26 = vcombine.low %v960_v16, %v964_v18  ;;  %v3373_v27 = vcombine.high %v967_v22, %v971_v51  ;;  %v1020_v15 = vld [vmem:[#allocation8 + $0x578] sm:$0xff]  ;;  %v3414_v18 = vcombine.low %v1008_v42, %v1012_v44 }
 0x1ba   :  { %2697 = vmatprep.subr.bf16.mxu1 %v3319_v29  ;;  %v3375_v29 = vcombine.high %v968_v23, %v972_v24 }
 0x1bc   :  { %2612 = vmatpush1.bf16.msra.mxu0 %v3316_v52  ;;  %v3372_v52 = vcombine.low %v967_v22, %v971_v51  ;;  %v1024_v22 = vld [vmem:[#allocation8 + $0x598] sm:$0xff] }
 0x1bd   :  { %2698 = vmatpush1.bf16.msra.mxu1 %v3318_v34  ;;  %2613 = vmatprep.subr.bf16.mxu0 %v3325_v35  ;;  %v3374_v34 = vcombine.low %v968_v23, %v972_v24  ;;  %v3381_v35 = vcombine.high %v975_v30, %v979_v31  ;;  %v1028_v51 = vld [vmem:[#allocation8 + $0x5b8] sm:$0xff]  ;;  %v3422_v24 = vcombine.low %v1016_v14, %v1020_v15 }
 0x1be   :  { %2699 = vmatprep.subr.bf16.mxu1 %v3327_v55  ;;  %v3383_v55 = vcombine.high %v976_v32, %v980_v33  ;;  %v1032_v30 = vld [vmem:[#allocation8 + $0x5d8] sm:$0xff] }
 0x1bf   :  { %v1036_v31 = vld [vmem:[#allocation8 + $0x5f8] sm:$0xff] }
 0x1c0   :  { %2614 = vmatpush1.bf16.msra.mxu0 %v3324_v47  ;;  %v988_v47 = vld [vmem:[#allocation8 + $0x478] sm:$0xff] }
 0x1c1   :  { %2700 = vmatpush1.bf16.msra.mxu1 %v3326_v48  ;;  %2615 = vmatprep.subr.bf16.mxu0 %v3333_v58  ;;  %v3382_v48 = vcombine.low %v976_v32, %v980_v33  ;;  %v3389_v58 = vcombine.high %v983_v28, %v987_v36  ;;  %v3391_v56 = vcombine.high %v984_v38, %v988_v47 }
 0x1c2   :  { %2701 = vmatprep.subr.bf16.mxu1 %v3335_v53  ;;  %v991_v53 = vld [vmem:[#allocation8 + $0x490] sm:$0xff]  ;;  %v3430_v33 = vcombine.low %v1024_v22, %v1028_v51 }
 0x1c4   :  { %2616 = vmatpush1.bf16.msra.mxu0 %v3332_v61  ;;  %v3388_v61 = vcombine.low %v983_v28, %v987_v36  ;;  %v1040_v28 = vld [vmem:[#allocation8 + $0x618] sm:$0xff] }
 0x1c5   :  { %2702 = vmatpush1.bf16.msra.mxu1 %v3334_v62  ;;  %2617 = vmatprep.subr.bf16.mxu0 %v3341_v63  ;;  %v3390_v62 = vcombine.low %v984_v38, %v988_v47  ;;  %v3397_v63 = vcombine.high %v991_v53, %v995_v54  ;;  %v1044_v36 = vld [vmem:[#allocation8 + $0x638] sm:$0xff]  ;;  %v3438_v38 = vcombine.low %v1032_v30, %v1036_v31 }
 0x1c6   :  { %2703 = vmatprep.subr.bf16.mxu1 %v3343_v1  ;;  %v3399_v1 = vcombine.high %v992_v43, %v996_v59 }
 0x1c8   :  { %2618 = vmatpush1.bf16.msra.mxu0 %v3340_v7  ;;  %v3396_v7 = vcombine.low %v991_v53, %v995_v54  ;;  %v1051_v53 = vld [vmem:[#allocation8 + $0x670] sm:$0xff]  ;;  %v1048_v54 = vld [vmem:[#allocation8 + $0x658] sm:$0xff] }
 0x1c9   :  { %2704 = vmatpush1.bf16.msra.mxu1 %v3342_v0  ;;  %2619 = vmatprep.subr.bf16.mxu0 %v3349_v60  ;;  %v3405_v0 = vcombine.high %v999_v57, %v1003_v4  ;;  %v3407_v60 = vcombine.high %v1000_v5, %v1004_v6 }
 0x1ca   :  { %2705 = vmatprep.subr.bf16.mxu1 %v3351_v8  ;;  %v1007_v8 = vld [vmem:[#allocation8 + $0x510] sm:$0xff] }
 0x1cb   :  { %v3412_v16 = vcombine.low %v1007_v8, %v1011_v41 }
 0x1cc   :  { %2620 = vmatpush1.bf16.msra.mxu0 %v3348_v9  ;;  %v3413_v9 = vcombine.high %v1007_v8, %v1011_v41  ;;  %v1064_v8 = vld [vmem:[#allocation8 + $0x6d8] sm:$0xff] }
 0x1cd   :  { %2706 = vmatpush1.bf16.msra.mxu1 %v3350_v10  ;;  %2621 = vmatprep.subr.bf16.mxu0 %v3357_v12  ;;  %v3415_v10 = vcombine.high %v1008_v42, %v1012_v44  ;;  %v1015_v12 = vld [vmem:[#allocation8 + $0x550] sm:$0xff]  ;;  %v1068_v41 = vld [vmem:[#allocation8 + $0x6f8] sm:$0xff] }
 0x1ce   :  { %2707 = vmatprep.subr.bf16.mxu1 %v3359_v13  ;;  %v1019_v13 = vld [vmem:[#allocation8 + $0x570] sm:$0xff] }
 0x1cf   :  { %v3420_v23 = vcombine.low %v1015_v12, %v1019_v13 }
 0x1d0   :  { %2622 = vmatpush1.bf16.msra.mxu0 %v3356_v19  ;;  %v3421_v19 = vcombine.high %v1015_v12, %v1019_v13  ;;  %v1072_v12 = vld [vmem:[#allocation8 + $0x718] sm:$0xff] }
 0x1d1   :  { %2708 = vmatpush1.bf16.msra.mxu1 %v3358_v20  ;;  %2623 = vmatprep.subr.bf16.mxu0 %v3365_v21  ;;  %v3423_v20 = vcombine.high %v1016_v14, %v1020_v15  ;;  %v1023_v21 = vld [vmem:[#allocation8 + $0x590] sm:$0xff]  ;;  %v1076_v13 = vld [vmem:[#allocation8 + $0x738] sm:$0xff]  ;;  %v3470_v15 = vcombine.low %v1064_v8, %v1068_v41 }
 0x1d2   :  { %2709 = vmatprep.subr.bf16.mxu1 %v3367_v17  ;;  %v1027_v17 = vld [vmem:[#allocation8 + $0x5b0] sm:$0xff] }
 0x1d3   :  { %v3428_v32 = vcombine.low %v1023_v21, %v1027_v17 }
 0x1d4   :  { %2624 = vmatpush1.bf16.msra.mxu0 %v3364_v25  ;;  %v3429_v25 = vcombine.high %v1023_v21, %v1027_v17  ;;  %v1080_v21 = vld [vmem:[#allocation8 + $0x758] sm:$0xff] }
 0x1d5   :  { %2710 = vmatpush1.bf16.msra.mxu1 %v3366_v26  ;;  %2625 = vmatprep.subr.bf16.mxu0 %v3373_v27  ;;  %v3431_v26 = vcombine.high %v1024_v22, %v1028_v51  ;;  %v1031_v27 = vld [vmem:[#allocation8 + $0x5d0] sm:$0xff]  ;;  %v1084_v17 = vld [vmem:[#allocation8 + $0x778] sm:$0xff]  ;;  %v3478_v51 = vcombine.low %v1072_v12, %v1076_v13 }
 0x1d6   :  { %2711 = vmatprep.subr.bf16.mxu1 %v3375_v29  ;;  %v1035_v29 = vld [vmem:[#allocation8 + $0x5f0] sm:$0xff] }
 0x1d8   :  { %2626 = vmatpush1.bf16.msra.mxu0 %v3372_v52  ;;  %v3437_v52 = vcombine.high %v1031_v27, %v1035_v29 }
 0x1d9   :  { %2712 = vmatpush1.bf16.msra.mxu1 %v3374_v34  ;;  %2638 = vmatprep.subr.bf16.mxu0 %v3381_v35  ;;  %v3439_v34 = vcombine.high %v1032_v30, %v1036_v31  ;;  %v1039_v35 = vld [vmem:[#allocation8 + $0x610] sm:$0xff]  ;;  %v3486_v31 = vcombine.low %v1080_v21, %v1084_v17 }
 0x1da   :  { %2724 = vmatprep.subr.bf16.mxu1 %v3383_v55  ;;  %v1043_v55 = vld [vmem:[#allocation8 + $0x630] sm:$0xff] }
 0x1db   :  { %2628 = vmatmul.mubr.bf16.vlgmr.msra.gmra.mrb[8].mxu0 %v3986_v39  ;;  %v3445_v47 = vcombine.high %v1039_v35, %v1043_v55 }
 0x1dc   :  { %2714 = vmatmul.mubr.bf16.vlgmr.msra.gmra.mrb[12].mxu1 %v3986_v39  ;;  %2639 = vmatpush1.bf16.msra.mxu0 %v3380_v37  ;;  %v3398_v39 = vcombine.low %v992_v43, %v996_v59  ;;  %v3436_v37 = vcombine.low %v1031_v27, %v1035_v29  ;;  %v3444_v43 = vcombine.low %v1039_v35, %v1043_v55  ;;  %v1088_v27 = vld [vmem:[#allocation8 + $0x798] sm:$0xff] }
 0x1dd   :  { %2670 = vmatprep.mubr.bf16.mxu0 %v4014_v11  ;;  %2725 = vmatpush1.bf16.msra.mxu1 %v3382_v48  ;;  %v3447_v48 = vcombine.high %v1040_v28, %v1044_v36  ;;  %v3446_v59 = vcombine.low %v1040_v28, %v1044_v36  ;;  %v1092_v29 = vld [vmem:[#allocation8 + $0x7b8] sm:$0xff] }
 0x1de   :  { %2756 = vmatprep.mubr.bf16.mxu1 %v4014_v11  ;;  %2640 = vmatprep.subr.bf16.mxu0 %v3389_v58  ;;  %v3404_v11 = vcombine.low %v999_v57, %v1003_v4  ;;  %v1047_v58 = vld [vmem:[#allocation8 + $0x650] sm:$0xff]  ;;  %v1056_v57 = vld [vmem:[#allocation8 + $0x698] sm:$0xff]  ;;  %v3494_v36 = vcombine.low %v1088_v27, %v1092_v29 }
 0x1df   :  { %2726 = vmatprep.subr.bf16.mxu1 %v3391_v56  ;;  %v1052_v56 = vld [vmem:[#allocation8 + $0x678] sm:$0xff]  ;;  %v3452_v5 = vcombine.low %v1047_v58, %v1051_v53 }
 0x1e0   :  { %2641 = vmatpush1.bf16.msra.mxu0 %v3388_v61  ;;  %v3453_v61 = vcombine.high %v1047_v58, %v1051_v53  ;;  %v1060_v4 = vld [vmem:[#allocation8 + $0x6b8] sm:$0xff]  ;;  %v3454_v6 = vcombine.low %v1048_v54, %v1052_v56  ;;  %v4029_v58 = vld [vmem:[%s4093_s7] sm:$0xff] }
 0x1e1   :  { %2727 = vmatpush1.bf16.msra.mxu1 %v3390_v62  ;;  %2642 = vmatprep.subr.bf16.mxu0 %v3397_v63  ;;  %v3455_v62 = vcombine.high %v1048_v54, %v1052_v56  ;;  %v1055_v63 = vld [vmem:[#allocation8 + $0x690] sm:$0xff]  ;;  %v3462_v44 = vcombine.low %v1056_v57, %v1060_v4  ;;  %v1096_v35 = vld [vmem:[#allocation8 + $0x7d8] sm:$0xff]  ;;  %v2826_v53 = vrot.slane %v4029_v58, %v3972_v3  ;;  %v4038_v54 = vld [vmem:[%s4092_s6] sm:$0xff] }
 0x1e2   :  { %2728 = vmatprep.subr.bf16.mxu1 %v3399_v1  ;;  %v1059_v1 = vld [vmem:[#allocation8 + $0x6b0] sm:$0xff]  ;;  %v1100_v55 = vld [vmem:[#allocation8 + $0x7f8] sm:$0xff]  ;;  %v1106_v56 = vrot.slane %v4038_v54, %v3969_v2 }
 0x1e3   :  { %v3460_v42 = vcombine.low %v1055_v63, %v1059_v1 }
 0x1e4   :  { %2643 = vmatpush1.bf16.msra.mxu0 %v3396_v7  ;;  %v3461_v7 = vcombine.high %v1055_v63, %v1059_v1 }
 0x1e5   :  { %2729 = vmatpush1.bf16.msra.mxu1 %v3398_v39  ;;  %2644 = vmatprep.subr.bf16.mxu0 %v3405_v0  ;;  %v3463_v39 = vcombine.high %v1056_v57, %v1060_v4  ;;  %v1063_v0 = vld [vmem:[#allocation8 + $0x6d0] sm:$0xff] }
 0x1e6   :  { %2730 = vmatprep.subr.bf16.mxu1 %v3407_v60  ;;  %v1067_v60 = vld [vmem:[#allocation8 + $0x6f0] sm:$0xff] }
 0x1e7   :  { %v3468_v14 = vcombine.low %v1063_v0, %v1067_v60 }
 0x1e8   :  { %2645 = vmatpush1.bf16.msra.mxu0 %v3404_v11  ;;  %v3469_v11 = vcombine.high %v1063_v0, %v1067_v60 }
 0x1e9   :  { %2731 = vmatpush1.bf16.msra.mxu1 %v3406_v45  ;;  %2646 = vmatprep.subr.bf16.mxu0 %v3413_v9  ;;  %v3471_v45 = vcombine.high %v1064_v8, %v1068_v41  ;;  %v1071_v9 = vld [vmem:[#allocation8 + $0x710] sm:$0xff] }
 0x1ea   :  { %2732 = vmatprep.subr.bf16.mxu1 %v3415_v10  ;;  %v1075_v10 = vld [vmem:[#allocation8 + $0x730] sm:$0xff] }
 0x1eb   :  { %v3476_v22 = vcombine.low %v1071_v9, %v1075_v10 }
 0x1ec   :  { %2647 = vmatpush1.bf16.msra.mxu0 %v3412_v16  ;;  %v3477_v16 = vcombine.high %v1071_v9, %v1075_v10 }
 0x1ed   :  { %2733 = vmatpush1.bf16.msra.mxu1 %v3414_v18  ;;  %2648 = vmatprep.subr.bf16.mxu0 %v3421_v19  ;;  %v3479_v18 = vcombine.high %v1072_v12, %v1076_v13  ;;  %v1079_v19 = vld [vmem:[#allocation8 + $0x750] sm:$0xff] }
 0x1ee   :  { %2734 = vmatprep.subr.bf16.mxu1 %v3423_v20  ;;  %v1083_v20 = vld [vmem:[#allocation8 + $0x770] sm:$0xff] }
 0x1ef   :  { %v3484_v30 = vcombine.low %v1079_v19, %v1083_v20 }
 0x1f0   :  { %2649 = vmatpush1.bf16.msra.mxu0 %v3420_v23  ;;  %v3485_v23 = vcombine.high %v1079_v19, %v1083_v20 }
 0x1f1   :  { %2735 = vmatpush1.bf16.msra.mxu1 %v3422_v24  ;;  %2650 = vmatprep.subr.bf16.mxu0 %v3429_v25  ;;  %v3487_v24 = vcombine.high %v1080_v21, %v1084_v17  ;;  %v1087_v25 = vld [vmem:[#allocation8 + $0x790] sm:$0xff] }
 0x1f2   :  { %2736 = vmatprep.subr.bf16.mxu1 %v3431_v26  ;;  %v1091_v26 = vld [vmem:[#allocation8 + $0x7b0] sm:$0xff] }
 0x1f3   :  { %v3492_v28 = vcombine.low %v1087_v25, %v1091_v26 }
 0x1f4   :  { %2651 = vmatpush1.bf16.msra.mxu0 %v3428_v32  ;;  %v3493_v32 = vcombine.high %v1087_v25, %v1091_v26  ;;  %v2822_v26 = vrot.slane %v4029_v58, %v3969_v2  ;;  %v1133_v2 = vsub.s32 7, %v3939_v49 }
 0x1f5   :  { %2737 = vmatpush1.bf16.msra.mxu1 %v3430_v33  ;;  %2652 = vmatprep.subr.bf16.mxu0 %v3437_v52  ;;  %v3495_v33 = vcombine.high %v1088_v27, %v1092_v29  ;;  %v1095_v52 = vld [vmem:[#allocation8 + $0x7d0] sm:$0xff]  ;;  %v2834_v27 = vrot.slane %v4029_v58, %v4001_v40  ;;  %v1125_v29 = vsub.s32 5, %v3939_v49 }
 0x1f6   :  { %2738 = vmatprep.subr.bf16.mxu1 %v3439_v34  ;;  %v1099_v34 = vld [vmem:[#allocation8 + $0x7f0] sm:$0xff] }
 0x1f8   :  { %2653 = vmatpush1.bf16.msra.mxu0 %v3436_v37  ;;  %v3501_v37 = vcombine.high %v1095_v52, %v1099_v34 }
 0x1f9   :  { %2739 = vmatpush1.bf16.msra.mxu1 %v3438_v38  ;;  %2654 = vmatprep.subr.bf16.mxu0 %v3445_v47  ;;  %v3503_v38 = vcombine.high %v1096_v35, %v1100_v55  ;;  %v3500_v47 = vcombine.low %v1095_v52, %v1099_v34  ;;  %v1126_v34 = vrot.slane %v4038_v54, %v1125_v29 }
 0x1fa   :  { %2740 = vmatprep.subr.bf16.mxu1 %v3447_v48  ;;  %v3502_v48 = vcombine.low %v1096_v35, %v1100_v55  ;;  %v1134_v35 = vrot.slane %v4038_v54, %v1133_v2 }
 0x1fc   :  { %2655 = vmatpush1.bf16.msra.mxu0 %v3444_v43  ;;  %v1114_v43 = vrot.slane %v4038_v54, %v3942_v50 }
 0x1fd   :  { %2741 = vmatpush1.bf16.msra.mxu1 %v3446_v59  ;;  %2656 = vmatprep.subr.bf16.mxu0 %v3453_v61  ;;  %v1110_v59 = vrot.slane %v4038_v54, %v3972_v3  ;;  %v1118_v61 = vrot.slane %v4038_v54, %v4001_v40 }
 0x1fe   :  { %2742 = vmatprep.subr.bf16.mxu1 %v3455_v62 }
 0x200   :  { %2657 = vmatpush1.bf16.msra.mxu0 %v3452_v5 }
 0x201   :  { %2743 = vmatpush1.bf16.msra.mxu1 %v3454_v6  ;;  %2658 = vmatprep.subr.bf16.mxu0 %v3461_v7 }
 0x202   :  { %2744 = vmatprep.subr.bf16.mxu1 %v3463_v39 }
 0x204   :  { %2659 = vmatpush1.bf16.msra.mxu0 %v3460_v42 }
 0x205   :  { %2745 = vmatpush1.bf16.msra.mxu1 %v3462_v44  ;;  %2660 = vmatprep.subr.bf16.mxu0 %v3469_v11 }
 0x206   :  { %2746 = vmatprep.subr.bf16.mxu1 %v3471_v45 }
 0x208   :  { %2661 = vmatpush1.bf16.msra.mxu0 %v3468_v14 }
 0x209   :  { %2747 = vmatpush1.bf16.msra.mxu1 %v3470_v15  ;;  %2662 = vmatprep.subr.bf16.mxu0 %v3477_v16 }
 0x20a   :  { %2748 = vmatprep.subr.bf16.mxu1 %v3479_v18 }
 0x20c   :  { %2663 = vmatpush1.bf16.msra.mxu0 %v3476_v22 }
 0x20d   :  { %2749 = vmatpush1.bf16.msra.mxu1 %v3478_v51  ;;  %2664 = vmatprep.subr.bf16.mxu0 %v3485_v23 }
 0x20e   :  { %2750 = vmatprep.subr.bf16.mxu1 %v3487_v24 }
 0x210   :  { %2665 = vmatpush1.bf16.msra.mxu0 %v3484_v30  ;;  %v2830_v30 = vrot.slane %v4029_v58, %v3942_v50 }
 0x211   :  { %2751 = vmatpush1.bf16.msra.mxu1 %v3486_v31  ;;  %2666 = vmatprep.subr.bf16.mxu0 %v3493_v32  ;;  %v2842_v31 = vrot.slane %v4029_v58, %v1125_v29  ;;  %v1121_v32 = vsub.s32 4, %v3939_v49 }
 0x212   :  { %2752 = vmatprep.subr.bf16.mxu1 %v3495_v33  ;;  %v1129_v33 = vsub.s32 6, %v3939_v49 }
 0x213   :  { %v1122_v40 = vrot.slane %v4038_v54, %v1121_v32 }
 0x214   :  { %2667 = vmatpush1.bf16.msra.mxu0 %v3492_v28  ;;  %v1130_v52 = vrot.slane %v4038_v54, %v1129_v33 }
 0x215   :  { %2753 = vmatpush1.bf16.msra.mxu1 %v3494_v36  ;;  %2668 = vmatprep.subr.bf16.mxu0 %v3501_v37 }
 0x216   :  { %2754 = vmatprep.subr.bf16.mxu1 %v3503_v38 }
 0x218   :  { %2669 = vmatpush1.bf16.msra.mxu0 %v3500_v47 }
 0x219   :  { %2755 = vmatpush1.bf16.msra.mxu1 %v3502_v48 }
 0x21b   :  { %2671 = vmatmul.mubr.bf16.vlgmr.msra.gmra.mrb[8].mxu0 %v4012_v46 }
 0x21c   :  { %2757 = vmatmul.mubr.bf16.vlgmr.msra.gmra.mrb[12].mxu1 %v4012_v46  ;;  %2923 = vmatprep.mubr.f32.mxu0 %v2826_v53 }
 0x26e   :  { %v2500_v62 = vpop.f32.mrb[4].mxu0  ;;  %v2586_v46 = vpop.f32.mrb[8].mxu1 }
 0x26f   :  { %v3532_v63 = vadd.f32 %v2500_v62, %v1106_v56  ;;  %v3536_v1 = vadd.f32 %v2586_v46, %v1114_v43  ;;  %v2502_v57 = vpop.f32.mrb[5].mxu0  ;;  %v2588_v4 = vpop.f32.mrb[9].mxu1 }
 0x270   :  { %v3533_v5 = vadd.f32 %v2502_v57, %v1110_v59  ;;  %v3537_v6 = vadd.f32 %v2588_v4, %v1118_v61  ;;  %v2504_v7 = vpop.f32.mrb[6].mxu0  ;;  %v2590_v39 = vpop.f32.mrb[10].mxu1 }
 0x271   :  { %vm2767_vm11 = vcmp.gt.f32.partialorder %v3532_v63, 0.0  ;;  %v2783_v0 = vmul.f32 0.2, %v3532_v63  ;;  %vm2769_vm12 = vcmp.gt.f32.partialorder %v3536_v1, 0.0  ;;  %v2785_v60 = vmul.f32 0.2, %v3536_v1 }
 0x272   :  { %vm2768_vm13 = vcmp.gt.f32.partialorder %v3533_v5, 0.0  ;;  %v2784_v8 = vmul.f32 0.2, %v3533_v5  ;;  %vm2770_vm14 = vcmp.gt.f32.partialorder %v3537_v6, 0.0  ;;  %v2786_v3 = vmul.f32 0.2, %v3537_v6 }
 0x273   :  { %v3534_v41 = vadd.f32 %v2504_v7, %v1106_v56  ;;  %v3538_v42 = vadd.f32 %v2590_v39, %v1114_v43  ;;  %v2506_v44 = vpop.f32.mrb[7].mxu0  ;;  %v2592_v11 = vpop.f32.mrb[11].mxu1  ;;  %v2799_v45 = vsel %vm2767_vm11, %v3532_v63, %v2783_v0  ;;  %v2801_v9 = vsel %vm2769_vm12, %v3536_v1, %v2785_v60 }
 0x274   :  { %v3535_v10 = vadd.f32 %v2506_v44, %v1110_v59  ;;  %v3539_v12 = vadd.f32 %v2592_v11, %v1118_v61  ;;  %v2800_v20 = vsel %vm2768_vm13, %v3533_v5, %v2784_v8  ;;  %v2802_v21 = vsel %vm2770_vm14, %v3537_v6, %v2786_v3 }
 0x275   :  { %vm2775_vm15 = vcmp.gt.f32.partialorder %v3534_v41, 0.0  ;;  %v2791_v13 = vmul.f32 0.2, %v3534_v41  ;;  %vm2777_vm0 = vcmp.gt.f32.partialorder %v3538_v42, 0.0  ;;  %v2793_v14 = vmul.f32 0.2, %v3538_v42 }
 0x276   :  { %vm2776_vm1 = vcmp.gt.f32.partialorder %v3535_v10, 0.0  ;;  %v2792_v15 = vmul.f32 0.2, %v3535_v10  ;;  %vm2778_vm2 = vcmp.gt.f32.partialorder %v3539_v12, 0.0  ;;  %v2794_v16 = vmul.f32 0.2, %v3539_v12 }
 0x277   :  { %v2807_v18 = vsel %vm2775_vm15, %v3534_v41, %v2791_v13  ;;  %v2809_v19 = vsel %vm2777_vm0, %v3538_v42, %v2793_v14  ;;  %v2850_v13 = vrot.slane %v4029_v58, %v1133_v2  ;;  %v2846_v14 = vrot.slane %v4029_v58, %v1129_v33 }
 0x278   :  { %v3506_v17 = vpack.c.bf16 %v2807_v18, %v2799_v45  ;;  %v3510_v22 = vpack.c.bf16 %v2809_v19, %v2801_v9  ;;  %v2808_v51 = vsel %vm2776_vm1, %v3535_v10, %v2792_v15  ;;  %v2810_v23 = vsel %vm2778_vm2, %v3539_v12, %v2794_v16 }
 0x279   :  { %v3504_v24 = vpack.c.bf16 %v2808_v51, %v2800_v20  ;;  %v3508_v25 = vpack.c.bf16 %v2810_v23, %v2802_v21  ;;  %v2838_v12 = vrot.slane %v4029_v58, %v1121_v32  ;;  %v2817_v15 = vstv %s4094_s8  ;;  %s3776_s8 = scalar_lea.vmem %s3157_s15, 16 }
 0x27a   :  { %vm3148_vm12 = vcmask 122880   ;;  %p3777_p10 = scmp.ne.s32.totalorder %s3157_s15, %s3776_s8  ;;  %p3782_p12 = scmp.lt.s32.totalorder %s3780_s16, %s3776_s8 }
 0x27b   :  { %3505 = vmatprep.subr.bf16.mxu0 %v3504_v24 }
 0x27c   :  { %3507 = vmatpush1.bf16.xpose.msra.mxu0 %v3506_v17  ;;  %p3783_p13 = por %p3782_p12, %p3781_p11 }
 0x27d   :  { %3509 = vmatprep.subr.bf16.mxu0 %v3508_v25 }
 0x27e   :  { %p3784_p0 = pnand %p3783_p13, %p3777_p10 }
 0x283   :  { %2924 = vmatmul.mubr.f32.vlgmr.msra.gmra.mrb[12].mxu0 %v2822_v26 }
 0x284   :  { %3511 = vmatpush1.bf16.xpose.msra.mxu0 %v3510_v22  ;;  %2993 = vmatprep.mubr.f32.mxu0 %v2834_v27 }
 0x28b   :  { %2994 = vmatmul.mubr.f32.vlgmr.msra.gmra.mrb[12].mxu0 %v2830_v30 }
 0x28c   :  { %3063 = vmatprep.mubr.f32.mxu0 %v2842_v31 }
 0x2ee   :  { %v2672_v55 = vpop.f32.mrb[8].mxu0 }
 0x2ef   :  { %v3540_v50 = vadd.f32 %v2672_v55, %v1122_v40  ;;  %v2758_v28 = vpop.f32.mrb[12].mxu1  ;;  %v2674_v36 = vpop.f32.mrb[9].mxu0 }
 0x2f0   :  { %v3544_v37 = vadd.f32 %v2758_v28, %v1130_v52  ;;  %v3541_v38 = vadd.f32 %v2674_v36, %v1126_v34  ;;  %v2760_v47 = vpop.f32.mrb[13].mxu1  ;;  %v2676_v48 = vpop.f32.mrb[10].mxu0 }
 0x2f1   :  { %v2787_v53 = vmul.f32 0.2, %v3540_v50  ;;  %v3545_v56 = vadd.f32 %v2760_v47, %v1134_v35  ;;  %v3542_v43 = vadd.f32 %v2676_v48, %v1122_v40  ;;  %v2762_v49 = vpop.f32.mrb[14].mxu1  ;;  %v2678_v59 = vpop.f32.mrb[11].mxu0  ;;  %vm2771_vm3 = vcmp.gt.f32.partialorder %v3540_v50, 0.0 }
 0x2f2   :  { %vm2773_vm4 = vcmp.gt.f32.partialorder %v3544_v37, 0.0  ;;  %v2789_v61 = vmul.f32 0.2, %v3544_v37  ;;  %vm2772_vm5 = vcmp.gt.f32.partialorder %v3541_v38, 0.0  ;;  %v2764_v62 = vpop.f32.mrb[15].mxu1  ;;  %v3546_v63 = vadd.f32 %v2762_v49, %v1130_v52 }
 0x2f3   :  { %vm2779_vm6 = vcmp.gt.f32.partialorder %v3542_v43, 0.0  ;;  %v2788_v54 = vmul.f32 0.2, %v3541_v38  ;;  %v2795_v46 = vmul.f32 0.2, %v3542_v43  ;;  %v3543_v1 = vadd.f32 %v2678_v59, %v1126_v34 }
 0x2f4   :  { %v2803_v57 = vsel %vm2771_vm3, %v3540_v50, %v2787_v53  ;;  %vm2774_vm7 = vcmp.gt.f32.partialorder %v3545_v56, 0.0  ;;  %v2790_v4 = vmul.f32 0.2, %v3545_v56  ;;  %v3547_v5 = vadd.f32 %v2764_v62, %v1134_v35 }
 0x2f5   :  { %v2811_v6 = vsel %vm2779_vm6, %v3542_v43, %v2795_v46  ;;  %vm2781_vm8 = vcmp.gt.f32.partialorder %v3546_v63, 0.0  ;;  %v2797_v7 = vmul.f32 0.2, %v3546_v63  ;;  %vm2780_vm9 = vcmp.gt.f32.partialorder %v3543_v1, 0.0 }
 0x2f6   :  { %v3514_v39 = vpack.c.bf16 %v2811_v6, %v2803_v57  ;;  %v2796_v0 = vmul.f32 0.2, %v3543_v1  ;;  %vm2782_vm10 = vcmp.gt.f32.partialorder %v3547_v5, 0.0  ;;  %v2798_v60 = vmul.f32 0.2, %v3547_v5 }
 0x2f7   :  { %v2805_v8 = vsel %vm2773_vm4, %v3544_v37, %v2789_v61  ;;  %v2813_v3 = vsel %vm2781_vm8, %v3546_v63, %v2797_v7  ;;  %v2804_v41 = vsel %vm2772_vm5, %v3541_v38, %v2788_v54  ;;  %v2806_v11 = vsel %vm2774_vm7, %v3545_v56, %v2790_v4 }
 0x2f8   :  { %v3518_v42 = vpack.c.bf16 %v2813_v3, %v2805_v8  ;;  %v2812_v44 = vsel %vm2780_vm9, %v3543_v1, %v2796_v0  ;;  %v2814_v45 = vsel %vm2782_vm10, %v3547_v5, %v2798_v60 }
 0x2f9   :  { %v3512_v9 = vpack.c.bf16 %v2812_v44, %v2804_v41  ;;  %v3516_v10 = vpack.c.bf16 %v2814_v45, %v2806_v11 }
 0x2fb   :  { %3513 = vmatprep.subr.bf16.mxu0 %v3512_v9 }
 0x2fc   :  { %3515 = vmatpush1.bf16.xpose.msra.mxu0 %v3514_v39 }
 0x2fd   :  { %3517 = vmatprep.subr.bf16.mxu0 %v3516_v10 }
 0x303   :  { %3064 = vmatmul.mubr.f32.vlgmr.msra.gmra.mrb[12].mxu0 %v2838_v12 }
 0x304   :  { %3519 = vmatpush1.bf16.xpose.msra.mxu0 %v3518_v42  ;;  %3133 = vmatprep.mubr.f32.mxu0 %v2850_v13 }
 0x30b   :  { %3134 = vmatmul.mubr.f32.vlgmr.msra.gmra.mrb[12].mxu0 %v2846_v14 }
 0x3de   :  { %v3135_v16 = vpop.f32.mrb[12].mxu0 }
 0x3df   :  { %v3548_v18 = vadd.f32 %v3135_v16, %v2817_v15  ;;  %v3137_v19 = vpop.f32.mrb[13].mxu0 }
 0x3e1   :  { %vm3139_vm11 = vcmp.ge.f32.partialorder %v3548_v18, 0.0  ;;  %v3140_v20 = vsub.f32 0.0, %v3548_v18 }
 0x3e3   :  { %v3141_v21 = vsel %vm3139_vm11, %v3140_v20, %v3548_v18 }
 0x3e4   :  { %v3142_v17 = vmul.f32 1.442695, %v3141_v21 }
 0x3e6   :  { %3706 = vpow2.f32 %v3142_v17 }
 0x3f0   :  { %v3707_v22 = vpop.eup %3706 }
 0x3f1   :  { %v3145_v51 = vadd.f32 1.0, %v3707_v22  ;;  %v3144_v58 = vsel %vm3139_vm11, 1.0, %v3707_v22 }
 0x3f3   :  { %3708 = vrcp.f32 %v3145_v51 }
 0x3fd   :  { %v3709_v23 = vpop.eup %3708 }
 0x3fe   :  { %v3147_v24 = vmul.f32 %v3709_v23, %v3144_v58 }
 0x400   :  { %3149 = vst.msk [vmem:[#allocation9] sm:$0x1] %vm3148_vm12, %v3147_v24 }
 0x401   :  { %3787 = shalt.err (!%p3784_p0)
}
 0x402   :  { %s3788_s19 = scalar_lea.hbm %s4095_s9, 16 }
 0x403   :  { %p3789_p1 = scmp.ne.s32.totalorder %s4095_s9, %s3788_s19  ;;  %p3792_p2 = scmp.lt.u32.totalorder %s3788_s19, %s4095_s9 }
 0x405   :  { %p3794_p3 = pnand %p3792_p2, %p3789_p1 }
 0x407   :  { %3797 = shalt.err (!%p3794_p3)
}
 0x408   :  { %3159 = dma.vmem_to_hbm [thread:$0]  %s3157_s15, 16, %s4095_s9, [#allocation5]  }
 0x409   :  { %3802 = dma.done.wait [#allocation5], 16  }
 0x40a   :  { %3803 = vsyncadd [#allocation5], 4294967280 }
 0x40b   :  { %3163 = vsyncpa [#allocation4], 1 }
 0x40c   :  { %3164 = vsyncpa [#allocation7], 1 }
 0x40d   :  { %3165 = vsyncpa [#allocation5], 1 }

</bundles_post_ra>
